<compile_context>
chip_gen: v6e
topology: v6e:2x2x1
jax: 0.10.0
libtpu: 0.0.40
codegen_flags: <defaults>
</compile_context>

<pallas_src>
import jax
import jax.numpy as jnp
from jax.experimental import pallas as pl
from jax.experimental.pallas import tpu as pltpu

C_FIXED = 256   # the module hard-codes Conv2d(256, 256, 1)
LANE = 128


def _round_up(x, m):
    return ((x + m - 1) // m) * m


def _ca_kernel(x_ref, w_ref, out_ref, atte_ref):
    # x_ref:    (256, t)   in-channels x pixels, input dtype (f32)
    # w_ref:    (256, 256) conv weight W[co, ci], compute dtype (bf16)
    # out_ref:  (256, t)   gated output
    # atte_ref: (256, t)   attention map (bf16 by default)
    x = x_ref[...]
    # MXU matmul: bf16 inputs, f32 accumulation.
    y = jnp.dot(w_ref[...], x.astype(w_ref.dtype),
                preferred_element_type=jnp.float32)            # (256, t) f32
    # Exact sigmoid: exp -> EUP, exact reciprocal (1/inf = 0 handles the
    # strongly-negative-y limit correctly).  Free under the per-step DMA time.
    atte = pl.reciprocal(1.0 + jnp.exp(-y), approx=False)
    out_ref[...] = (x * atte).astype(out_ref.dtype)
    atte_ref[...] = atte.astype(atte_ref.dtype)


def _ca_kernel_noatte(x_ref, w_ref, out_ref):
    x = x_ref[...]
    y = jnp.dot(w_ref[...], x.astype(w_ref.dtype),
                preferred_element_type=jnp.float32)
    atte = pl.reciprocal(1.0 + jnp.exp(-y), approx=False)
    out_ref[...] = (x * atte).astype(out_ref.dtype)


def _pick_tile(hw_pad, t_hw, n_batch):
    """Lane-dense spatial tile; prefer one that divides hw_pad (no ragged tail)."""
    t_cap = max(LANE, (t_hw // LANE) * LANE)
    if hw_pad <= t_cap:
        t = hw_pad
    else:
        t = 0
        cand = t_cap
        while cand >= 512:
            if hw_pad % cand == 0:
                t = cand
                break
            cand -= LANE
        if t == 0:
            # No reasonable divisor: accept a ragged last tile (Pallas masks it).
            t = t_cap
    # v7x megacore: make sure the (N, tiles) grid has >= 2 steps so both
    # TensorCores get work; otherwise one TC idles and effective HBM BW halves.
    if n_batch * pl.cdiv(hw_pad, t) < 2 and hw_pad >= 2 * LANE:
        t = _round_up(hw_pad // 2, LANE)
    return t


def ca_layer_a(inp, weight, *, t_hw=2048, compute_dtype=jnp.bfloat16,
               atte_dtype=jnp.bfloat16, out_dtype=None, return_atte=True):
    """CALayera forward.

    inp:    (N, 256, H, W) NCHW.
    weight: (256, 256) = Conv2d(256, 256, 1, bias=False).weight[:, :, 0, 0].
    Returns (inp * atte, atte) (both NCHW) when return_atte=True, else just
    inp * atte.  atte_dtype defaults to bf16 to cut HBM write traffic; set
    return_atte=False (MySCN only consumes index [0]) to drop it entirely.
    """
    N, C, H, W = inp.shape
    assert C == C_FIXED, "CALayera hard-codes 256 channels"
    HW = H * W
    out_dtype = inp.dtype if out_dtype is None else out_dtype

    # Free view of the NCHW buffer; no transpose.
    x3d = inp.reshape(N, C, HW)

    # Keep the spatial (lane) axis a multiple of 128 so output stores are
    # unmasked.  The pad is one cheap XLA op, only hit for odd/small HW.
    HW_pad = _round_up(HW, LANE)
    if HW_pad != HW:
        x3d = jnp.pad(x3d, ((0, 0), (0, 0), (0, HW_pad - HW)))

    w = weight.astype(compute_dtype)  # cast the grid-invariant weight once

    t = _pick_tile(HW_pad, t_hw, N)
    num_tiles = pl.cdiv(HW_pad, t)
    grid = (N, num_tiles)

    # Scoped-VMEM budget: double-buffered x/out(/atte) tiles + resident weight
    # buffers, plus in-kernel temporaries (bf16 x copy, f32 y/atte) and slack.
    in_b = jnp.dtype(inp.dtype).itemsize
    ot_b = jnp.dtype(out_dtype).itemsize
    cp_b = jnp.dtype(compute_dtype).itemsize
    at_b = jnp.dtype(atte_dtype).itemsize if return_atte else 0
    buf_bytes = 2 * C * t * (in_b + ot_b + at_b) + 2 * C * C * cp_b
    tmp_bytes = C * t * (cp_b + 2 * 4) + (4 << 20)
    try:
        info = pltpu.get_tpu_info()
        vmem_cap = int(getattr(info, "vmem_capacity_bytes", 64 << 20))
    except Exception:  # pragma: no cover - conservative fallback
        vmem_cap = 64 << 20
    vmem_ceiling = (vmem_cap * 3) // 4          # 25% headroom for compiler scratch
    vmem_limit = int(min(max(buf_bytes + tmp_bytes, 16 << 20), vmem_ceiling))

    in_specs = [
        pl.BlockSpec((None, C, t), lambda n, j: (n, 0, j)),
        # Constant block index: the weight is fetched once and stays resident.
        pl.BlockSpec((C, C), lambda n, j: (0, 0)),
    ]
    out_spec = pl.BlockSpec((None, C, t), lambda n, j: (n, 0, j))
    cparams = pltpu.CompilerParams(
        dimension_semantics=("parallel", "parallel"),
        vmem_limit_bytes=vmem_limit)

    if return_atte:
        out3d, atte3d = pl.pallas_call(
            _ca_kernel,
            out_shape=(
                jax.ShapeDtypeStruct((N, C, HW_pad), out_dtype),
                jax.ShapeDtypeStruct((N, C, HW_pad), atte_dtype),
            ),
            grid_spec=pltpu.PrefetchScalarGridSpec(
                num_scalar_prefetch=0, grid=grid,
                in_specs=in_specs, out_specs=[out_spec, out_spec]),
            compiler_params=cparams,
        )(x3d, w)
    else:
        out3d = pl.pallas_call(
            _ca_kernel_noatte,
            out_shape=jax.ShapeDtypeStruct((N, C, HW_pad), out_dtype),
            grid_spec=pltpu.PrefetchScalarGridSpec(
                num_scalar_prefetch=0, grid=grid,
                in_specs=in_specs, out_specs=out_spec),
            compiler_params=cparams,
        )(x3d, w)
        atte3d = None

    def _unpack(a):
        if HW_pad != HW:
            a = a[:, :, :HW]
        return a.reshape(N, C, H, W)

    if return_atte:
        return _unpack(out3d), _unpack(atte3d)
    return _unpack(out3d)


def _reference(inp, weight):
    # Pure-JAX f32 reference: 1x1 conv (no bias) + sigmoid, then gate.
    atte = jax.nn.sigmoid(jnp.einsum('nchw,oc->nohw', inp, weight))
    return inp * atte, atte


if __name__ == "__main__":
    key = jax.random.PRNGKey(0)
    k_x, k_w, k_x2 = jax.random.split(key, 3)

    C = C_FIXED  # channel count is fixed at 256 by the module
    # Deterministic Conv2d(256, 256, 1, bias=False) weight
    # (kaiming-uniform-like bound).
    fan_in = C * 1 * 1
    bound = 1.0 / (fan_in ** 0.5)
    w = jax.random.uniform(k_w, (C, C), dtype=jnp.float32,
                           minval=-bound, maxval=bound)

    # Case 1: lane-aligned spatial extent (HW = 256, multiple of 128).
    N, H, W = 2, 16, 16
    x = jax.random.normal(k_x, (N, C, H, W), dtype=jnp.float32)
    out, atte = ca_layer_a(x, w)
    out, atte = jax.block_until_ready(out), jax.block_until_ready(atte)
    ref_out, ref_atte = _reference(x, w)
    # bf16 MXU inputs (f32 accumulation) + bf16 atte output => ~1e-3 level err.
    assert jnp.allclose(atte.astype(jnp.float32), ref_atte,
                        atol=1e-2, rtol=1e-2), (
        float(jnp.max(jnp.abs(atte.astype(jnp.float32) - ref_atte))))
    assert jnp.allclose(out, ref_out, atol=1e-2, rtol=1e-2), (
        float(jnp.max(jnp.abs(out - ref_out))))

    # Case 2: production path (atte dropped) on a non-128-multiple HW (8x8=64),
    # exercising the lane-padding path.
    x2 = jax.random.normal(k_x2, (1, C, 8, 8), dtype=jnp.float32)
    out2 = jax.block_until_ready(ca_layer_a(x2, w, return_atte=False))
    ref_out2, _ = _reference(x2, w)
    assert jnp.allclose(out2, ref_out2, atol=1e-2, rtol=1e-2), (
        float(jnp.max(jnp.abs(out2 - ref_out2))))

    print("KERNEL_OK")
</pallas_src>

<mosaic_0001>
module attributes {stable_mosaic.version = 11 : i64} {
  func.func @_ca_kernel(%arg0: i32, %arg1: i32, %arg2: memref<1x256x256xf32, #tpu.memory_space<vmem>>, %arg3: memref<256x256xbf16, #tpu.memory_space<vmem>>, %arg4: memref<1x256x256xf32, #tpu.memory_space<vmem>>, %arg5: memref<1x256x256xbf16, #tpu.memory_space<vmem>>) attributes {dimension_semantics = [#tpu.dimension_semantics<parallel>, #tpu.dimension_semantics<parallel>], iteration_bounds = array<i64: 2, 1>, scalar_prefetch = 0 : i64, scratch_operands = 0 : i64, tpu.core_type = #tpu.core_type<tc>, window_params = [{transform_indices = @transform_0, window_bounds = array<i64: 1, 256, 256>}, {pipeline_mode = #tpu.pipeline_mode<synchronous>, transform_indices = @transform_1, window_bounds = array<i64: 256, 256>}, {transform_indices = @transform_2, window_bounds = array<i64: 1, 256, 256>}, {transform_indices = @transform_3, window_bounds = array<i64: 1, 256, 256>}]} {
    %c0 = arith.constant 0 : index
    %c0_0 = arith.constant 0 : index
    %c0_1 = arith.constant 0 : index
    %0 = vector.load %arg2[%c0, %c0_0, %c0_1] : memref<1x256x256xf32, #tpu.memory_space<vmem>>, vector<1x256x256xf32>
    %1 = vector.shape_cast %0 : vector<1x256x256xf32> to vector<256x256xf32>
    %c0_2 = arith.constant 0 : index
    %c0_3 = arith.constant 0 : index
    %2 = vector.load %arg3[%c0_2, %c0_3] : memref<256x256xbf16, #tpu.memory_space<vmem>>, vector<256x256xbf16>
    %3 = arith.truncf %1 : vector<256x256xf32> to vector<256x256xbf16>
    %cst = arith.constant dense<0.000000e+00> : vector<256x256xf32>
    %4 = tpu.matmul %2, %3, %cst {dimension_numbers = #tpu.dot_dimension_numbers<[1], [0], [0], [1], [0, 0, 1, 1], [], []>} : vector<256x256xbf16>, vector<256x256xbf16>, vector<256x256xf32> -> vector<256x256xf32>
    %cst_4 = arith.constant 0.000000e+00 : f32
    %5 = vector.broadcast %cst_4 : f32 to vector<256x256xf32>
    %6 = arith.subf %5, %4 : vector<256x256xf32>
    %7 = math.exp %6 : vector<256x256xf32>
    %cst_5 = arith.constant 1.000000e+00 : f32
    %8 = vector.broadcast %cst_5 : f32 to vector<256x256xf32>
    %9 = arith.addf %8, %7 : vector<256x256xf32>
    %10 = tpu.reciprocal %9 : vector<256x256xf32> -> vector<256x256xf32>
    %11 = arith.mulf %1, %10 : vector<256x256xf32>
    %c0_6 = arith.constant 0 : index
    %c0_7 = arith.constant 0 : index
    %c0_8 = arith.constant 0 : index
    %12 = vector.load %arg4[%c0_6, %c0_7, %c0_8] : memref<1x256x256xf32, #tpu.memory_space<vmem>>, vector<1x256x256xf32>
    %13 = vector.shape_cast %12 : vector<1x256x256xf32> to vector<256x256xf32>
    %14 = vector.shape_cast %11 : vector<256x256xf32> to vector<1x256x256xf32>
    tpu.vector_store %arg4[%c0_6, %c0_7, %c0_8], %14 {strides = array<i32>} : memref<1x256x256xf32, #tpu.memory_space<vmem>>, vector<1x256x256xf32>,
    %15 = arith.truncf %10 : vector<256x256xf32> to vector<256x256xbf16>
    %c0_9 = arith.constant 0 : index
    %c0_10 = arith.constant 0 : index
    %c0_11 = arith.constant 0 : index
    %16 = vector.load %arg5[%c0_9, %c0_10, %c0_11] : memref<1x256x256xbf16, #tpu.memory_space<vmem>>, vector<1x256x256xbf16>
    %17 = vector.shape_cast %16 : vector<1x256x256xbf16> to vector<256x256xbf16>
    %18 = vector.shape_cast %15 : vector<256x256xbf16> to vector<1x256x256xbf16>
    tpu.vector_store %arg5[%c0_9, %c0_10, %c0_11], %18 {strides = array<i32>} : memref<1x256x256xbf16, #tpu.memory_space<vmem>>, vector<1x256x256xbf16>,
    return
  }
  func.func @transform_0(%arg0: i32, %arg1: i32) -> (i32, i32, i32) {
    %c0_i32 = arith.constant 0 : i32
    %c0_i32_0 = arith.constant 0 : i32
    return %arg0, %c0_i32, %arg1 : i32, i32, i32
  }
  func.func @transform_1(%arg0: i32, %arg1: i32) -> (i32, i32) {
    %c0_i32 = arith.constant 0 : i32
    %c0_i32_0 = arith.constant 0 : i32
    %c0_i32_1 = arith.constant 0 : i32
    return %c0_i32, %c0_i32_0 : i32, i32
  }
  func.func @transform_2(%arg0: i32, %arg1: i32) -> (i32, i32, i32) {
    %c0_i32 = arith.constant 0 : i32
    %c0_i32_0 = arith.constant 0 : i32
    return %arg0, %c0_i32, %arg1 : i32, i32, i32
  }
  func.func @transform_3(%arg0: i32, %arg1: i32) -> (i32, i32, i32) {
    %c0_i32 = arith.constant 0 : i32
    %c0_i32_0 = arith.constant 0 : i32
    return %arg0, %c0_i32, %arg1 : i32, i32, i32
  }
}

</mosaic_0001>

<bundles_post_ra>
// kernel: tpu_custom_call.1
= control target key start
LH: loop header
LB: loop body
LE: loop exit
PB: predicated region body
PF: predicated region fallthrough
CT: control target
= control target key end

     0   :  { %9 = vsyncpa [#allocation3], 0  ;;  %s2987_s0 = inlined_call_operand.hbm [shape: f32[2,256,256], index: 0, kind: input, shape index: {}]   ;;  %s2988_s1 = inlined_call_operand.hbm [shape: bf16[256,256], index: 1, kind: input, shape index: {}]   ;;  %s2989_s2 = inlined_call_operand.hbm [shape: f32[2,256,256], index: 2, kind: output, shape index: {0}]   ;;  %s2990_s3 = inlined_call_operand.hbm [shape: bf16[2,256,256], index: 3, kind: output, shape index: {1}]  }
   0x1   :  { %11 = vsyncpa [#allocation3 + $0x1], 0 }
   0x2   :  { %12 = vsyncpa [#allocation6], 0 }
   0x3   :  { %13 = vsyncpa [#allocation4], 0 }
   0x4   :  { %15 = vsyncpa [#allocation4 + $0x1], 0 }
   0x5   :  { %16 = vsyncpa [#allocation9], 0 }
   0x6   :  { %18 = vsyncpa [#allocation9 + $0x1], 0  ;;  %s2347_s12 = smov 0   ;;  %s2349_s13 = smov 0  }
   0x7   :  { %s2351_s14 = smov 0   ;;  %s2353_s15 = smov 0  }
   0x8   :  { %s2355_s16 = smov 0   ;;  %s2357_s17 = smov 0  }
   0x9 LB: > { %s1562_s18 = sadd.s32 4294967295, %s2313_s17   ;;  %s1563_s19 = sadd.s32 4294967294, %s2313_s17   ;;  %s2313_s17 = sphi %s2357_s17, %s24_s17   ;;  %s2309_s16 = sphi %s2355_s16, %s3008_s16   ;;  %s2305_s15 = sphi %s2353_s15, %s3007_s15   ;;  %s2301_s14 = sphi %s2351_s14, %s3006_s14   ;;  %s2297_s13 = sphi %s2349_s13, %s3005_s13   ;;  %s2293_s12 = sphi %s2347_s12, %s3004_s12  }
   0xa   : > { %p58_p0 = scmp.ne.s32.totalorder %s2297_s13, %s2293_s12  ;;  %p2381_p1 = scmp.eq.s32.totalorder %s1562_s18, 0 }
   0xb   : > { %p2385_p2 = scmp.eq.s32.totalorder %s1562_s18, 1  ;;  %p111_p3 = scmp.eq.s32.totalorder %s1563_s19, 1 }
   0xc   : > { %p2391_p4 = por %p2381_p1, %p58_p0  ;;  %p1564_p5 = scmp.ge.s32.totalorder %s2313_s17, 1 }
   0xd   : > { %p2396_p6 = por %p111_p3, %p58_p0  ;;  %p146_p7 = scmp.lt.s32.totalorder %s2313_s17, 3 }
   0xe   : > { %s2994_s22 = scalar_select %p2391_p4, 1, 0 }
   0xf   : > { %s2995_s23 = scalar_select %p2396_p6, 1, 0 }
  0x10   : > { %p2401_p8 = pnand %p1564_p5, %p146_p7  ;;  %s2315_s25 = smov [#allocation5]  }
  0x11   : > { %s158_s26 = sshll.u32 %s2315_s25, 4  ;;  %s36_s28 = sadd.s32 1, %s2309_s16  ;;  %s159_s26 = int_to_ptr.vmem [resolvable:$true] %s158_s26 }
  0x12   : > { %p1724_p9 = pneg %p2401_p8  ;;  %s2156_s29 = scalar_lea.vmem %s159_s26, 4096 }
  0x13   : > { %p2157_p13 = scmp.ne.s32.totalorder %s159_s26, %s2156_s29  ;;  %p2164_p5 = scmp.lt.s32.totalorder %s159_s26, %s159_s26 }
  0x14   : > { %p2410_p11 = pnand %p1724_p9, %p2381_p1  ;;  %p2165_p7 = scmp.lt.s32.totalorder %s2156_s29, %s2156_s29 }
  0x16   : > { %p2147_p12 = pneg %p2410_p11  ;;  %p2166_p6 = por %p2165_p7, %p2164_p5 }
  0x18   : > { %p2159_p0 = pnand %p2157_p13, %p2147_p12 }
  0x1a   : > { %p2160_p3 = pneg %p2159_p0 }
  0x1c   : > { %p2167_p4 = pnand %p2166_p6, %p2160_p3 }
  0x1e   : > { %2170 = shalt.err (!%p2167_p4)
}
  0x1f   : > { %s2316_s30 = smov 128   ;;  %s2317_s4 = smov 8  }
  0x20   : > { %1727 = dma.hbm_to_vmem [thread:$0]  (!%p2410_p11), %s2988_s1, 4096, %s159_s26, [#allocation6], %s2316_s30, %s2316_s30, %s2317_s4  }
  0x21   : > { %p38_p6 = scmp.ge.s32.totalorder %s36_s28, 2  ;;  %s45_s7 = sadd.s32 1, %s2301_s14 }
  0x22   : > { %p52_p4 = scmp.ne.s32.totalorder %s2301_s14, %s2297_s13  ;;  %p53_p9 = scmp.eq.s32.totalorder %s2313_s17, 0 }
  0x23   : > { %s3010_s28 = smov (%p38_p6, %s36_s28), 0  ;;  %p1740_p0 = scmp.lt.s32.totalorder %s2313_s17, 2 }
  0x24   : > { %p2428_p12 = por %p53_p9, %p52_p4  ;;  %p2434_p13 = por %p2385_p2, %p52_p4 }
  0x25   : > { %s40_s10 = ssub.s32 %s2309_s16, %s3010_s28  ;;  %s172_s11 = sand.u32 1, %s2301_s14  }
  0x26   : > { %p43_p11 = scmp.eq.s32.totalorder %s40_s10, 0  ;;  %s1567_s18 = sshll.u32 %s172_s11, 9 }
  0x27   : > { %s1647_s25 = sshll.u32 %s2309_s16, 13  ;;  %s176_s30 = scalar_lea.vmem [#allocation2], %s1567_s18 }
  0x28   : > { %s2443_s19 = scalar_select %p43_p11, %s2301_s14, %s45_s7  }
  0x29   : > { %s184_s29 = scalar_lea.hbm %s2987_s0, %s1647_s25  ;;  %s185_s4 = sshll.u32 %s176_s30, 4  ;;  %s186_s4 = int_to_ptr.vmem [resolvable:$true] %s185_s4 }
  0x2a   : > { %p2451_p2 = pnand %p1740_p0, %p2428_p12  ;;  %s173_s5 = scalar_lea.sflag [#allocation3], %s172_s11 }
  0x2b   : > { %s2184_s6 = scalar_lea.vmem %s186_s4, 8192  ;;  %s2318_s7 = smov [#allocation2]  }
  0x2c   : > { %p2173_p3 = pneg %p2451_p2  ;;  %p2185_p5 = scmp.ne.s32.totalorder %s186_s4, %s2184_s6 }
  0x2d   : > { %s2189_s10 = sshll.u32 %s2318_s7, 4  ;;  %s2190_s10 = int_to_ptr.vmem [resolvable:$false] %s2189_s10 }
  0x2e   : > { %p2187_p7 = pnand %p2185_p5, %p2173_p3  ;;  %s2191_s25 = scalar_lea.vmem %s2190_s10, 16384 }
  0x2f   : > { %p2192_p4 = scmp.lt.s32.totalorder %s186_s4, %s2190_s10  ;;  %p2193_p9 = scmp.lt.s32.totalorder %s2191_s25, %s2184_s6 }
  0x30   : > { %p2188_p6 = pneg %p2187_p7 }
  0x31   : > { %p2194_p11 = por %p2193_p9, %p2192_p4 }
  0x33   : > { %p2195_p10 = pnand %p2194_p11, %p2188_p6 }
  0x35   : > { %2198 = shalt.err (!%p2195_p10)
}
  0x36   : > { %s2319_s8 = smov 256   ;;  %s2320_s18 = smov 16  }
  0x37   : > { %1731 = dma.hbm_to_vmem [thread:$0]  (!%p2451_p2), %s184_s29, 8192, %s186_s4, %s173_s5, %s2319_s8, %s2319_s8, %s2320_s18  }
  0x38   : > { %197 = sbr.rel (%p2401_p8) target bundleno = 508 (0x1fc), region = 28  ;;  %s2462_s11 = sand.u32 (!%p2401_p8), 1, %s2297_s13  }
  0x39   : > { %s1571_s26 = sshll.u32 (!%p2401_p8), %s2462_s11, 9  ;;  %s200_s27 = scalar_lea.sflag (!%p2401_p8), [#allocation3], %s2462_s11 }
  0x3a   : > { %s2468_s30 = scalar_lea.vmem (!%p2401_p8), [#allocation2], %s1571_s26  ;;  %p3001_p10 = scmp.ne.s32.totalorder (!%p2401_p8), %s2994_s22, 0 }
  0x3d   : > { %2276 = dma.done.wait (%p3001_p10), %s200_s27, 8192  }
  0x3e   : > { %2278 = vsyncadd (%p3001_p10), %s200_s27, 4294959104 }
  0x3f   : > { %2280 = dma.done.wait (%p2381_p1), [#allocation6], 4096  }
  0x40   : > { %2282 = vsyncadd (%p2381_p1), [#allocation6], 4294963200  ;;  %v267_v0 = vld [vmem:[%s2468_s30 + $0xe8] sm:$0xff]  ;;  %v269_v1 = vld [vmem:[%s2468_s30 + $0xf8] sm:$0xff]  ;;  %s1574_s20 = sshll.u32 %s2462_s11, 8  ;;  %s2646_s22 = scalar_lea.vmem [#allocation7], %s1571_s26 }
  0x41   : > { %v266_v2 = vld [vmem:[%s2468_s30 + $0xe0] sm:$0xff]  ;;  %v349_v3 = vpack.c.bf16 %v269_v1, %v267_v0  ;;  %v268_v4 = vld [vmem:[%s2468_s30 + $0xf0] sm:$0xff]  ;;  %v263_v5 = vld [vmem:[%s2468_s30 + $0xc8] sm:$0xff]  ;;  %s2657_s24 = scalar_lea.vmem [#allocation8], %s1574_s20  ;;  %s1680_s29 = sshll.u32 %s2305_s15, 13 }
  0x42   : > { %v265_v6 = vld [vmem:[%s2468_s30 + $0xd8] sm:$0xff]  ;;  %v348_v7 = vpack.c.bf16 %v268_v4, %v266_v2  ;;  %v262_v9 = vld [vmem:[%s2468_s30 + $0xc0] sm:$0xff]  ;;  %v264_v10 = vld [vmem:[%s2468_s30 + $0xd0] sm:$0xff]  ;;  %s1412_s4 = sshll.u32 %s2646_s22, 4  ;;  %s2891_s6 = scalar_lea.hbm %s2989_s2, %s1680_s29  ;;  %s2901_s4 = int_to_ptr.vmem [resolvable:$true] %s1412_s4 }
  0x43   : > { %v347_v8 = vpack.c.bf16 %v265_v6, %v263_v5  ;;  %v259_v11 = vld [vmem:[%s2468_s30 + $0xa8] sm:$0xff]  ;;  %526 = vmatprep.subr.bf16.mxu0 %v349_v3  ;;  %1682 = vmatprep.subr.bf16.mxu1 %v349_v3  ;;  %v261_v12 = vld [vmem:[%s2468_s30 + $0xb8] sm:$0xff]  ;;  %v346_v13 = vpack.c.bf16 %v264_v10, %v262_v9  ;;  %v258_v15 = vld [vmem:[%s2468_s30 + $0xa0] sm:$0xff]  ;;  %s1681_s7 = sshll.u32 %s2305_s15, 12  ;;  %s1430_s10 = sshll.u32 %s2657_s24, 4  ;;  %s2912_s10 = int_to_ptr.vmem [resolvable:$true] %s1430_s10 }
  0x44   : > { %527 = vmatpush1.bf16.msra.mxu0 %v348_v7  ;;  %1698 = vmatpush1.bf16.msra.mxu1 %v348_v7  ;;  %v345_v14 = vpack.c.bf16 %v261_v12, %v259_v11  ;;  %v260_v16 = vld [vmem:[%s2468_s30 + $0xb0] sm:$0xff]  ;;  %v255_v17 = vld [vmem:[%s2468_s30 + $0x88] sm:$0xff]  ;;  %v257_v18 = vld [vmem:[%s2468_s30 + $0x98] sm:$0xff]  ;;  %s2910_s8 = scalar_lea.hbm %s2990_s3, %s1681_s7  ;;  %s1392_s18 = scalar_lea.sflag [#allocation4], %s2462_s11 }
  0x45   : > { %528 = vmatprep.subr.bf16.mxu0 %v347_v8  ;;  %1683 = vmatprep.subr.bf16.mxu1 %v347_v8  ;;  %v344_v19 = vpack.c.bf16 %v260_v16, %v258_v15  ;;  %v343_v20 = vpack.c.bf16 %v257_v18, %v255_v17  ;;  %v254_v21 = vld [vmem:[%s2468_s30 + $0x80] sm:$0xff]  ;;  %v256_v22 = vld [vmem:[%s2468_s30 + $0x90] sm:$0xff]  ;;  %v251_v23 = vld [vmem:[%s2468_s30 + $0x68] sm:$0xff]  ;;  %s2199_s26 = scalar_lea.vmem %s2901_s4, 8192  ;;  %s2321_s27 = smov [#allocation7]  }
  0x46   : > { %v253_v24 = vld [vmem:[%s2468_s30 + $0x78] sm:$0xff]  ;;  %v342_v25 = vpack.c.bf16 %v256_v22, %v254_v21  ;;  %v250_v27 = vld [vmem:[%s2468_s30 + $0x60] sm:$0xff]  ;;  %v252_v28 = vld [vmem:[%s2468_s30 + $0x70] sm:$0xff]  ;;  %p2200_p1 = scmp.ne.s32.totalorder %s2901_s4, %s2199_s26 }
  0x47   : > { %v341_v26 = vpack.c.bf16 %v253_v24, %v251_v23  ;;  %v247_v29 = vld [vmem:[%s2468_s30 + $0x48] sm:$0xff]  ;;  %v249_v30 = vld [vmem:[%s2468_s30 + $0x58] sm:$0xff]  ;;  %v340_v31 = vpack.c.bf16 %v252_v28, %v250_v27  ;;  %v246_v33 = vld [vmem:[%s2468_s30 + $0x40] sm:$0xff] }
  0x48   : > { %529 = vmatpush1.bf16.msra.mxu0 %v346_v13  ;;  %1699 = vmatpush1.bf16.msra.mxu1 %v346_v13  ;;  %v339_v32 = vpack.c.bf16 %v249_v30, %v247_v29  ;;  %v248_v34 = vld [vmem:[%s2468_s30 + $0x50] sm:$0xff]  ;;  %v2503_v35 = vld [vmem:[%s2468_s30 + $0x28] sm:$0xff]  ;;  %v2506_v36 = vld [vmem:[%s2468_s30 + $0x38] sm:$0xff]  ;;  %p2201_p8 = pnand %p2200_p1, %p2434_p13 }
  0x49   : > { %530 = vmatprep.subr.bf16.mxu0 %v345_v14  ;;  %1684 = vmatprep.subr.bf16.mxu1 %v345_v14  ;;  %v338_v37 = vpack.c.bf16 %v248_v34, %v246_v33  ;;  %v2509_v38 = vld [vmem:[%s2468_s30 + $0x20] sm:$0xff]  ;;  %v2512_v39 = vld [vmem:[%s2468_s30 + $0x30] sm:$0xff]  ;;  %v337_v40 = vpack.c.bf16 %v2506_v36, %v2503_v35  ;;  %v2517_v41 = vld [vmem:[%s2468_s30 + $0x8] sm:$0xff] }
  0x4a   : > { %v2520_v42 = vld [vmem:[%s2468_s30 + $0x18] sm:$0xff]  ;;  %v1802_v43 = vld [vmem:[#allocation5 + $0x4] ss:$8 sps:$4 sm:$0xff]   ;;  %v336_v45 = vpack.c.bf16 %v2512_v39, %v2509_v38  ;;  %v2530_v48 = vld [vmem:[%s2468_s30 + $0x10] sm:$0xff]  ;;  %p2202_p12 = pneg %p2201_p8 }
  0x4b   : > { %v1805_v44 = vld [vmem:[#allocation5 + $0x84] ss:$8 sps:$4 sm:$0xff]   ;;  %v335_v47 = vpack.c.bf16 %v2520_v42, %v2517_v41  ;;  %v301_v50 = vld [vmem:[%s2468_s30 + $0x1f8] sm:$0xff]  ;;  %558 = vmatprep.mubr.bf16.mxu0 %v1802_v43  ;;  %v300_v53 = vld [vmem:[%s2468_s30 + $0x1f0] sm:$0xff] }
  0x4c   : > { %531 = vmatpush1.bf16.msra.mxu0 %v344_v19  ;;  %1700 = vmatpush1.bf16.msra.mxu1 %v344_v19  ;;  %v2525_v46 = vld [vmem:[%s2468_s30] sm:$0xff]  ;;  %v299_v49 = vld [vmem:[%s2468_s30 + $0x1e8] sm:$0xff]  ;;  %v297_v56 = vld [vmem:[%s2468_s30 + $0x1d8] sm:$0xff] }
  0x4d   : > { %532 = vmatprep.subr.bf16.mxu0 %v343_v20  ;;  %1685 = vmatprep.subr.bf16.mxu1 %v343_v20  ;;  %v334_v51 = vpack.c.bf16 %v2530_v48, %v2525_v46  ;;  %v298_v52 = vld [vmem:[%s2468_s30 + $0x1e0] sm:$0xff]  ;;  %v365_v54 = vpack.c.bf16 %v301_v50, %v299_v49  ;;  %v295_v55 = vld [vmem:[%s2468_s30 + $0x1c8] sm:$0xff]  ;;  %v296_v60 = vld [vmem:[%s2468_s30 + $0x1d0] sm:$0xff] }
  0x4e   : > { %638 = vmatprep.mubr.bf16.mxu1 %v1805_v44  ;;  %v364_v57 = vpack.c.bf16 %v300_v53, %v298_v52  ;;  %v294_v58 = vld [vmem:[%s2468_s30 + $0x1c0] sm:$0xff]  ;;  %v363_v59 = vpack.c.bf16 %v297_v56, %v295_v55  ;;  %v291_v61 = vld [vmem:[%s2468_s30 + $0x1a8] sm:$0xff]  ;;  %v293_v62 = vld [vmem:[%s2468_s30 + $0x1b8] sm:$0xff] }
  0x4f   : > { %v362_v63 = vpack.c.bf16 %v296_v60, %v294_v58  ;;  %v290_v0 = vld [vmem:[%s2468_s30 + $0x1a0] sm:$0xff]  ;;  %v292_v1 = vld [vmem:[%s2468_s30 + $0x1b0] sm:$0xff]  ;;  %v361_v2 = vpack.c.bf16 %v293_v62, %v291_v61  ;;  %v287_v3 = vld [vmem:[%s2468_s30 + $0x188] sm:$0xff] }
  0x50   : > { %533 = vmatpush1.bf16.msra.mxu0 %v342_v25  ;;  %1701 = vmatpush1.bf16.msra.mxu1 %v342_v25  ;;  %v289_v4 = vld [vmem:[%s2468_s30 + $0x198] sm:$0xff]  ;;  %v360_v5 = vpack.c.bf16 %v292_v1, %v290_v0  ;;  %v286_v6 = vld [vmem:[%s2468_s30 + $0x180] sm:$0xff]  ;;  %v288_v8 = vld [vmem:[%s2468_s30 + $0x190] sm:$0xff] }
  0x51   : > { %534 = vmatprep.subr.bf16.mxu0 %v341_v26  ;;  %1686 = vmatprep.subr.bf16.mxu1 %v341_v26  ;;  %v359_v7 = vpack.c.bf16 %v289_v4, %v287_v3  ;;  %v2551_v9 = vld [vmem:[%s2468_s30 + $0x168] sm:$0xff]  ;;  %v285_v10 = vld [vmem:[%s2468_s30 + $0x178] sm:$0xff]  ;;  %v358_v11 = vpack.c.bf16 %v288_v8, %v286_v6  ;;  %v2556_v13 = vld [vmem:[%s2468_s30 + $0x160] sm:$0xff] }
  0x52   : > { %v357_v12 = vpack.c.bf16 %v285_v10, %v2551_v9  ;;  %v2559_v14 = vld [vmem:[%s2468_s30 + $0x170] sm:$0xff]  ;;  %v2562_v15 = vld [vmem:[%s2468_s30 + $0x148] sm:$0xff]  ;;  %v2565_v16 = vld [vmem:[%s2468_s30 + $0x158] sm:$0xff] }
  0x53   : > { %v356_v17 = vpack.c.bf16 %v2559_v14, %v2556_v13  ;;  %v355_v18 = vpack.c.bf16 %v2565_v16, %v2562_v15  ;;  %v2572_v19 = vld [vmem:[%s2468_s30 + $0x140] sm:$0xff]  ;;  %v2575_v20 = vld [vmem:[%s2468_s30 + $0x150] sm:$0xff]  ;;  %v2578_v21 = vld [vmem:[%s2468_s30 + $0x128] sm:$0xff] }
  0x54   : > { %535 = vmatpush1.bf16.msra.mxu0 %v340_v31  ;;  %1702 = vmatpush1.bf16.msra.mxu1 %v340_v31  ;;  %v2581_v22 = vld [vmem:[%s2468_s30 + $0x138] sm:$0xff]  ;;  %v354_v23 = vpack.c.bf16 %v2575_v20, %v2572_v19  ;;  %v2588_v25 = vld [vmem:[%s2468_s30 + $0x120] sm:$0xff]  ;;  %v2591_v26 = vld [vmem:[%s2468_s30 + $0x130] sm:$0xff] }
  0x55   : > { %536 = vmatprep.subr.bf16.mxu0 %v339_v32  ;;  %1687 = vmatprep.subr.bf16.mxu1 %v339_v32  ;;  %v353_v24 = vpack.c.bf16 %v2581_v22, %v2578_v21  ;;  %v2594_v27 = vld [vmem:[%s2468_s30 + $0x108] sm:$0xff]  ;;  %v2597_v28 = vld [vmem:[%s2468_s30 + $0x118] sm:$0xff]  ;;  %v352_v29 = vpack.c.bf16 %v2591_v26, %v2588_v25  ;;  %v2604_v31 = vld [vmem:[%s2468_s30 + $0x100] sm:$0xff] }
  0x56   : > { %v351_v30 = vpack.c.bf16 %v2597_v28, %v2594_v27  ;;  %v2607_v32 = vld [vmem:[%s2468_s30 + $0x110] sm:$0xff]  ;;  %v1800_v34 = vld [vmem:[#allocation5] ss:$8 sps:$4 sm:$0xff]   ;;  %v1814_v49 = vld [vmem:[#allocation5 + $0xa4] ss:$8 sps:$4 sm:$0xff]  }
  0x57   : > { %v350_v33 = vpack.c.bf16 %v2607_v32, %v2604_v31  ;;  %v1808_v43 = vld [vmem:[#allocation5 + $0x94] ss:$8 sps:$4 sm:$0xff]   ;;  %v1810_v44 = vld [vmem:[#allocation5 + $0x10] ss:$8 sps:$4 sm:$0xff]   ;;  %v1816_v50 = vld [vmem:[#allocation5 + $0x20] ss:$8 sps:$4 sm:$0xff]  }
  0x58   : > { %537 = vmatpush1.bf16.msra.mxu0 %v338_v37  ;;  %1703 = vmatpush1.bf16.msra.mxu1 %v338_v37  ;;  %v1803_v37 = vld [vmem:[#allocation5 + $0x80] ss:$8 sps:$4 sm:$0xff]   ;;  %v1818_v52 = vld [vmem:[#allocation5 + $0x34] ss:$8 sps:$4 sm:$0xff]   ;;  %v1823_v55 = vld [vmem:[#allocation5 + $0xb0] ss:$8 sps:$4 sm:$0xff]  }
  0x59   : > { %538 = vmatprep.subr.bf16.mxu0 %v337_v40  ;;  %1688 = vmatprep.subr.bf16.mxu1 %v337_v40  ;;  %v1806_v40 = vld [vmem:[#allocation5 + $0x14] ss:$8 sps:$4 sm:$0xff]   ;;  %v1824_v56 = vld [vmem:[#allocation5 + $0x44] ss:$8 sps:$4 sm:$0xff]   ;;  %v1828_v58 = vld [vmem:[#allocation5 + $0x40] ss:$8 sps:$4 sm:$0xff]  }
  0x5a   : > { %v1820_v53 = vld [vmem:[#allocation5 + $0xb4] ss:$8 sps:$4 sm:$0xff]   ;;  %v1834_v62 = vld [vmem:[#allocation5 + $0x50] ss:$8 sps:$4 sm:$0xff]   ;;  %v1836_v0 = vld [vmem:[#allocation5 + $0x64] ss:$8 sps:$4 sm:$0xff]  }
  0x5b   : > { %v1830_v60 = vld [vmem:[#allocation5 + $0x54] ss:$8 sps:$4 sm:$0xff]   ;;  %v1838_v1 = vld [vmem:[#allocation5 + $0xe4] ss:$8 sps:$4 sm:$0xff]   ;;  %v1841_v3 = vld [vmem:[#allocation5 + $0xe0] ss:$8 sps:$4 sm:$0xff]  }
  0x5c   : > { %539 = vmatpush1.bf16.msra.mxu0 %v336_v45  ;;  %1704 = vmatpush1.bf16.msra.mxu1 %v336_v45  ;;  %v1811_v45 = vld [vmem:[#allocation5 + $0x90] ss:$8 sps:$4 sm:$0xff]   ;;  %v1832_v61 = vld [vmem:[#allocation5 + $0xd4] ss:$8 sps:$4 sm:$0xff]  }
  0x5d   : > { %540 = vmatprep.subr.bf16.mxu0 %v335_v47  ;;  %1689 = vmatprep.subr.bf16.mxu1 %v335_v47  ;;  %v1812_v47 = vld [vmem:[#allocation5 + $0x24] ss:$8 sps:$4 sm:$0xff]   ;;  %v1842_v4 = vld [vmem:[#allocation5 + $0x74] ss:$8 sps:$4 sm:$0xff]   ;;  %v1846_v6 = vld [vmem:[#allocation5 + $0x70] ss:$8 sps:$4 sm:$0xff]  }
  0x60   : > { %541 = vmatpush1.bf16.msra.mxu0 %v334_v51  ;;  %1705 = vmatpush1.bf16.msra.mxu1 %v334_v51  ;;  %v1817_v51 = vld [vmem:[#allocation5 + $0xa0] ss:$8 sps:$4 sm:$0xff]  }
  0x61   : > { %542 = vmatprep.subr.bf16.mxu0 %v365_v54  ;;  %1690 = vmatprep.subr.bf16.mxu1 %v365_v54  ;;  %v1822_v54 = vld [vmem:[#allocation5 + $0x30] ss:$8 sps:$4 sm:$0xff]  }
  0x64   : > { %543 = vmatpush2.bf16.msra.mxu0 %v364_v57  ;;  %1706 = vmatpush2.bf16.msra.mxu1 %v364_v57  ;;  %v1826_v57 = vld [vmem:[#allocation5 + $0xc4] ss:$8 sps:$4 sm:$0xff]  }
  0x65   : > { %544 = vmatprep.subr.bf16.mxu0 %v363_v59  ;;  %1691 = vmatprep.subr.bf16.mxu1 %v363_v59  ;;  %v1829_v59 = vld [vmem:[#allocation5 + $0xc0] ss:$8 sps:$4 sm:$0xff]  }
  0x68   : > { %545 = vmatpush2.bf16.msra.mxu0 %v362_v63  ;;  %1707 = vmatpush2.bf16.msra.mxu1 %v362_v63  ;;  %v1835_v63 = vld [vmem:[#allocation5 + $0xd0] ss:$8 sps:$4 sm:$0xff]  }
  0x69   : > { %546 = vmatprep.subr.bf16.mxu0 %v361_v2  ;;  %1692 = vmatprep.subr.bf16.mxu1 %v361_v2  ;;  %v1840_v2 = vld [vmem:[#allocation5 + $0x60] ss:$8 sps:$4 sm:$0xff]  }
  0x6c   : > { %547 = vmatpush2.bf16.msra.mxu0 %v360_v5  ;;  %1708 = vmatpush2.bf16.msra.mxu1 %v360_v5  ;;  %v1844_v5 = vld [vmem:[#allocation5 + $0xf4] ss:$8 sps:$4 sm:$0xff]  }
  0x6d   : > { %548 = vmatprep.subr.bf16.mxu0 %v359_v7  ;;  %1693 = vmatprep.subr.bf16.mxu1 %v359_v7  ;;  %v1847_v7 = vld [vmem:[#allocation5 + $0xf0] ss:$8 sps:$4 sm:$0xff]  }
  0x70   : > { %549 = vmatpush2.bf16.msra.mxu0 %v358_v11  ;;  %1709 = vmatpush2.bf16.msra.mxu1 %v358_v11 }
  0x71   : > { %550 = vmatprep.subr.bf16.mxu0 %v357_v12  ;;  %1694 = vmatprep.subr.bf16.mxu1 %v357_v12 }
  0x74   : > { %551 = vmatpush2.bf16.msra.mxu0 %v356_v17  ;;  %1710 = vmatpush2.bf16.msra.mxu1 %v356_v17 }
  0x75   : > { %552 = vmatprep.subr.bf16.mxu0 %v355_v18  ;;  %1695 = vmatprep.subr.bf16.mxu1 %v355_v18 }
  0x78   : > { %553 = vmatpush2.bf16.msra.mxu0 %v354_v23  ;;  %1711 = vmatpush2.bf16.msra.mxu1 %v354_v23 }
  0x79   : > { %554 = vmatprep.subr.bf16.mxu0 %v353_v24  ;;  %1696 = vmatprep.subr.bf16.mxu1 %v353_v24 }
  0x7c   : > { %555 = vmatpush2.bf16.msra.mxu0 %v352_v29  ;;  %1712 = vmatpush2.bf16.msra.mxu1 %v352_v29 }
  0x7d   : > { %556 = vmatprep.subr.bf16.mxu0 %v351_v30  ;;  %1697 = vmatprep.subr.bf16.mxu1 %v351_v30 }
  0x80   : > { %557 = vmatpush2.bf16.msra.mxu0 %v350_v33  ;;  %1713 = vmatpush2.bf16.msra.mxu1 %v350_v33 }
  0x83   : > { %559 = vmatmul.mubr.bf16.vlgmr.msra.gmra.mxu0 %v1800_v34  ;;  %639 = vmatmul.mubr.bf16.vlgmr.msra.gmra.mxu1 %v1803_v37 }
  0x84   : > { %568 = vmatprep.mubr.bf16.mxu0 %v1806_v40  ;;  %648 = vmatprep.mubr.bf16.mxu1 %v1808_v43 }
  0x8b   : > { %569 = vmatmul.mubr.bf16.gmra.mxu0 %v1810_v44  ;;  %649 = vmatmul.mubr.bf16.gmra.mxu1 %v1811_v45 }
  0x8c   : > { %578 = vmatprep.mubr.bf16.mxu0 %v1812_v47  ;;  %658 = vmatprep.mubr.bf16.mxu1 %v1814_v49 }
  0x93   : > { %579 = vmatmul.mubr.bf16.gmra.mxu0 %v1816_v50  ;;  %659 = vmatmul.mubr.bf16.gmra.mxu1 %v1817_v51 }
  0x94   : > { %588 = vmatprep.mubr.bf16.mxu0 %v1818_v52  ;;  %668 = vmatprep.mubr.bf16.mxu1 %v1820_v53 }
  0x9b   : > { %589 = vmatmul.mubr.bf16.gmra.mxu0 %v1822_v54  ;;  %669 = vmatmul.mubr.bf16.gmra.mxu1 %v1823_v55 }
  0x9c   : > { %598 = vmatprep.mubr.bf16.mxu0 %v1824_v56  ;;  %678 = vmatprep.mubr.bf16.mxu1 %v1826_v57 }
  0xa3   : > { %599 = vmatmul.mubr.bf16.gmra.mxu0 %v1828_v58  ;;  %679 = vmatmul.mubr.bf16.gmra.mxu1 %v1829_v59 }
  0xa4   : > { %608 = vmatprep.mubr.bf16.mxu0 %v1830_v60  ;;  %688 = vmatprep.mubr.bf16.mxu1 %v1832_v61 }
  0xab   : > { %609 = vmatmul.mubr.bf16.gmra.mxu0 %v1834_v62  ;;  %689 = vmatmul.mubr.bf16.gmra.mxu1 %v1835_v63 }
  0xac   : > { %618 = vmatprep.mubr.bf16.mxu0 %v1836_v0  ;;  %698 = vmatprep.mubr.bf16.mxu1 %v1838_v1 }
  0xb3   : > { %619 = vmatmul.mubr.bf16.gmra.mxu0 %v1840_v2  ;;  %699 = vmatmul.mubr.bf16.gmra.mxu1 %v1841_v3 }
  0xb4   : > { %628 = vmatprep.mubr.bf16.mxu0 %v1842_v4  ;;  %708 = vmatprep.mubr.bf16.mxu1 %v1844_v5 }
  0xbb   : > { %629 = vmatmul.mubr.bf16.gmra.mxu0 %v1846_v6  ;;  %709 = vmatmul.mubr.bf16.gmra.mxu1 %v1847_v7 }
 0x143   : > { %v560_v8 = vpop.f32.mrf.mxu0  ;;  %v640_v10 = vpop.f32.mrf.mxu1 }
 0x144   : > { %v719_v11 = vsub.f32 0.0, %v560_v8  ;;  %v751_v12 = vsub.f32 0.0, %v640_v10 }
 0x145   : > { %v562_v17 = vpop.f32.mrf.mxu0  ;;  %v642_v18 = vpop.f32.mrf.mxu1 }
 0x146   : > { %v783_v23 = vmul.f32 1.442695, %v719_v11  ;;  %v847_v24 = vmul.f32 1.442695, %v751_v12  ;;  %v720_v29 = vsub.f32 0.0, %v562_v17  ;;  %v752_v30 = vsub.f32 0.0, %v642_v18 }
 0x147   : > { %v564_v33 = vpop.f32.mrf.mxu0  ;;  %v644_v34 = vpop.f32.mrf.mxu1 }
 0x148   : > { %1848 = vpow2.f32 %v783_v23  ;;  %v785_v37 = vmul.f32 1.442695, %v720_v29  ;;  %v849_v40 = vmul.f32 1.442695, %v752_v30  ;;  %v721_v43 = vsub.f32 0.0, %v564_v33 }
 0x149   : > { %1850 = vpow2.f32 %v847_v24  ;;  %v753_v44 = vsub.f32 0.0, %v644_v34  ;;  %v566_v45 = vpop.f32.mrf.mxu0  ;;  %v646_v47 = vpop.f32.mrf.mxu1 }
 0x14a   : > { %1852 = vpow2.f32 %v785_v37  ;;  %v787_v49 = vmul.f32 1.442695, %v721_v43  ;;  %v722_v50 = vsub.f32 0.0, %v566_v45  ;;  %v754_v51 = vsub.f32 0.0, %v646_v47 }
 0x14b   : > { %1854 = vpow2.f32 %v849_v40  ;;  %v851_v52 = vmul.f32 1.442695, %v753_v44  ;;  %v570_v53 = vpop.f32.mrf.mxu0  ;;  %v650_v54 = vpop.f32.mrf.mxu1 }
 0x14c   : > { %1856 = vpow2.f32 %v787_v49  ;;  %v789_v55 = vmul.f32 1.442695, %v722_v50  ;;  %v853_v56 = vmul.f32 1.442695, %v754_v51  ;;  %v723_v57 = vsub.f32 0.0, %v570_v53 }
 0x14d   : > { %1858 = vpow2.f32 %v851_v52  ;;  %v755_v58 = vsub.f32 0.0, %v650_v54  ;;  %v572_v59 = vpop.f32.mrf.mxu0  ;;  %v652_v60 = vpop.f32.mrf.mxu1 }
 0x14e   : > { %1860 = vpow2.f32 %v789_v55  ;;  %v791_v61 = vmul.f32 1.442695, %v723_v57  ;;  %v724_v62 = vsub.f32 0.0, %v572_v59  ;;  %v756_v63 = vsub.f32 0.0, %v652_v60 }
 0x14f   : > { %1862 = vpow2.f32 %v853_v56  ;;  %v855_v0 = vmul.f32 1.442695, %v755_v58  ;;  %v574_v1 = vpop.f32.mrf.mxu0  ;;  %v654_v2 = vpop.f32.mrf.mxu1 }
 0x150   : > { %1864 = vpow2.f32 %v791_v61  ;;  %v793_v3 = vmul.f32 1.442695, %v724_v62  ;;  %v857_v4 = vmul.f32 1.442695, %v756_v63  ;;  %v725_v5 = vsub.f32 0.0, %v574_v1 }
 0x151   : > { %1866 = vpow2.f32 %v855_v0  ;;  %v757_v6 = vsub.f32 0.0, %v654_v2  ;;  %v576_v7 = vpop.f32.mrf.mxu0  ;;  %v656_v8 = vpop.f32.mrf.mxu1 }
 0x152   : > { %1868 = vpow2.f32 %v793_v3  ;;  %v795_v10 = vmul.f32 1.442695, %v725_v5  ;;  %v726_v11 = vsub.f32 0.0, %v576_v7  ;;  %v758_v12 = vsub.f32 0.0, %v656_v8 }
 0x153   : > { %1870 = vpow2.f32 %v857_v4  ;;  %v859_v17 = vmul.f32 1.442695, %v757_v6  ;;  %v580_v18 = vpop.f32.mrf.mxu0  ;;  %v660_v23 = vpop.f32.mrf.mxu1 }
 0x154   : > { %1872 = vpow2.f32 %v795_v10  ;;  %v797_v24 = vmul.f32 1.442695, %v726_v11  ;;  %v861_v29 = vmul.f32 1.442695, %v758_v12  ;;  %v727_v1 = vsub.f32 0.0, %v580_v18 }
 0x155   : > { %v1849_v30 = vpop.eup %1848  ;;  %1874 = vpow2.f32 %v859_v17  ;;  %v2611_v33 = vpop.f32.mrf.mxu0  ;;  %v759_v4 = vsub.f32 0.0, %v660_v23 }
 0x156   : > { %v2613_v34 = vpop.f32.mrf.mxu1  ;;  %v1851_v37 = vpop.eup %1850  ;;  %v911_v40 = vadd.f32 1.0, %v1849_v30  ;;  %1876 = vpow2.f32 %v797_v24  ;;  %v728_v8 = vsub.f32 0.0, %v2611_v33 }
 0x157   : > { %v1853_v43 = vpop.eup %1852  ;;  %v943_v44 = vadd.f32 1.0, %v1851_v37  ;;  %1878 = vpow2.f32 %v861_v29  ;;  %v2615_v45 = vpop.f32.mrf.mxu0  ;;  %v760_v17 = vsub.f32 0.0, %v2613_v34  ;;  %v799_v29 = vmul.f32 1.442695, %v727_v1 }
 0x158   : > { %v1855_v47 = vpop.eup %1854  ;;  %1880 = vrcp.f32 %v911_v40  ;;  %v912_v49 = vadd.f32 1.0, %v1853_v43  ;;  %v2617_v50 = vpop.f32.mrf.mxu1  ;;  %v729_v23 = vsub.f32 0.0, %v2615_v45  ;;  %v863_v40 = vmul.f32 1.442695, %v759_v4 }
 0x159   : > { %v1857_v51 = vpop.eup %1856  ;;  %1882 = vrcp.f32 %v943_v44  ;;  %v944_v52 = vadd.f32 1.0, %v1855_v47  ;;  %v2619_v57 = vpop.f32.mrf.mxu0  ;;  %v761_v33 = vsub.f32 0.0, %v2617_v50 }
 0x15a   : > { %v1859_v53 = vpop.eup %1858  ;;  %1884 = vrcp.f32 %v912_v49  ;;  %v913_v54 = vadd.f32 1.0, %v1857_v51  ;;  %v2621_v60 = vpop.f32.mrf.mxu1  ;;  %v801_v49 = vmul.f32 1.442695, %v728_v8  ;;  %v730_v34 = vsub.f32 0.0, %v2619_v57 }
 0x15b   : > { %v1861_v55 = vpop.eup %1860  ;;  %1886 = vrcp.f32 %v944_v52  ;;  %v945_v56 = vadd.f32 1.0, %v1859_v53  ;;  %v2623_v5 = vpop.f32.mrf.mxu0  ;;  %v865_v53 = vmul.f32 1.442695, %v760_v17  ;;  %v867_v57 = vmul.f32 1.442695, %v761_v33 }
 0x15c   : > { %v1863_v58 = vpop.eup %1862  ;;  %1888 = vrcp.f32 %v913_v54  ;;  %v914_v59 = vadd.f32 1.0, %v1861_v55  ;;  %v2626_v10 = vpop.f32.mrf.mxu1  ;;  %v762_v54 = vsub.f32 0.0, %v2621_v60 }
 0x15d   : > { %v1865_v61 = vpop.eup %1864  ;;  %1890 = vrcp.f32 %v945_v56  ;;  %v946_v62 = vadd.f32 1.0, %v1863_v58  ;;  %v2631_v43 = vpop.f32.mrf.mxu0  ;;  %v803_v56 = vmul.f32 1.442695, %v729_v23  ;;  %v731_v58 = vsub.f32 0.0, %v2623_v5 }
 0x15e   : > { %v1867_v63 = vpop.eup %1866  ;;  %1892 = vrcp.f32 %v914_v59  ;;  %v915_v0 = vadd.f32 1.0, %v1865_v61  ;;  %v2635_v51 = vpop.f32.mrf.mxu1  ;;  %v869_v5 = vmul.f32 1.442695, %v762_v54  ;;  %v732_v8 = vsub.f32 0.0, %v2631_v43 }
 0x15f   : > { %v1869_v2 = vpop.eup %1868  ;;  %1894 = vrcp.f32 %v946_v62  ;;  %v947_v3 = vadd.f32 1.0, %v1867_v63  ;;  %v763_v62 = vsub.f32 0.0, %v2626_v10  ;;  %v2642_v63 = vpop.f32.mrf.mxu0 }
 0x160   : > { %v1871_v6 = vpop.eup %1870  ;;  %1896 = vrcp.f32 %v915_v0  ;;  %v916_v7 = vadd.f32 1.0, %v1869_v2  ;;  %v2650_v1 = vpop.f32.mrf.mxu1  ;;  %v809_v43 = vmul.f32 1.442695, %v732_v8 }
 0x161   : > { %v1873_v11 = vpop.eup %1872  ;;  %1898 = vrcp.f32 %v947_v3  ;;  %v948_v12 = vadd.f32 1.0, %v1871_v6  ;;  %v596_v17 = vpop.f32.mrf.mxu0 }
 0x162   : > { %v1875_v18 = vpop.eup %1874  ;;  %1900 = vrcp.f32 %v916_v7  ;;  %v917_v24 = vadd.f32 1.0, %v1873_v11  ;;  %v807_v7 = vmul.f32 1.442695, %v731_v58  ;;  %v871_v11 = vmul.f32 1.442695, %v763_v62  ;;  %v676_v23 = vpop.f32.mrf.mxu1 }
 0x163   : > { %v1877_v30 = vpop.eup %1876  ;;  %1902 = vrcp.f32 %v948_v12  ;;  %v949_v37 = vadd.f32 1.0, %v1875_v18  ;;  %v764_v12 = vsub.f32 0.0, %v2635_v51  ;;  %v2678_v51 = vpop.f32.mrf.mxu0 }
 0x164   : > { %v1879_v44 = vpop.eup %1878  ;;  %1904 = vrcp.f32 %v917_v24  ;;  %v918_v47 = vadd.f32 1.0, %v1877_v30  ;;  %v2682_v54 = vpop.f32.mrf.mxu1 }
 0x165   : > { %v1881_v52 = vpop.eup %1880  ;;  %1906 = vrcp.f32 %v949_v37  ;;  %v950_v45 = vadd.f32 1.0, %v1879_v44  ;;  %v734_v44 = vsub.f32 0.0, %v596_v17  ;;  %v2692_v62 = vpop.f32.mrf.mxu0 }
 0x166   : > { %v1883_v55 = vpop.eup %1882  ;;  %v1039_v50 = vmul.f32 %v1881_v52, %v2525_v46  ;;  %1908 = vrcp.f32 %v918_v47 }
 0x167   : > { %v1885_v59 = vpop.eup %1884  ;;  %v1071_v61 = vmul.f32 %v1883_v55, %v2604_v31  ;;  %1910 = vrcp.f32 %v950_v45  ;;  %v805_v31 = vmul.f32 1.442695, %v730_v34  ;;  %v766_v34 = vsub.f32 0.0, %v676_v23 }
 0x168   : > { %v1887_v0 = vpop.eup %1886  ;;  %1103 = vst [vmem:[%s2646_s22] sm:$0xff] %v1039_v50  ;;  %v1040_v46 = vmul.f32 %v1885_v59, %v2517_v41  ;;  %v1648_v60 = vpack.c.bf16 %v1885_v59, %v1881_v52  ;;  %1912 = vpow2.f32 %v799_v29  ;;  %v733_v29 = vsub.f32 0.0, %v2642_v63 }
 0x169   : > { %v1889_v2 = vpop.eup %1888  ;;  %1135 = vst [vmem:[%s2646_s22 + $0x100] sm:$0xff] %v1071_v61  ;;  %v1072_v3 = vmul.f32 %v1887_v0, %v2594_v27  ;;  %v1664_v4 = vpack.c.bf16 %v1887_v0, %v1883_v55  ;;  %1914 = vpow2.f32 %v863_v40  ;;  %v765_v40 = vsub.f32 0.0, %v2650_v1 }
 0x16a   : > { %v1891_v6 = vpop.eup %1890  ;;  %1104 = vst [vmem:[%s2646_s22 + $0x8] sm:$0xff] %v1040_v46  ;;  %1359 = vst [vmem:[%s2657_s24] sm:$0xff] %v1648_v60  ;;  %v1041_v41 = vmul.f32 %v1889_v2, %v2530_v48  ;;  %1916 = vpow2.f32 %v801_v49  ;;  %v813_v59 = vmul.f32 1.442695, %v734_v44  ;;  %v2696_v46 = vpop.f32.mrf.mxu1 }
 0x16b   : > { %v1893_v10 = vpop.eup %1892  ;;  %1136 = vst [vmem:[%s2646_s22 + $0x108] sm:$0xff] %v1072_v3  ;;  %1375 = vst [vmem:[%s2657_s24 + $0x80] sm:$0xff] %v1664_v4  ;;  %v1073_v27 = vmul.f32 %v1891_v6, %v2607_v32  ;;  %1918 = vpow2.f32 %v865_v53  ;;  %v811_v53 = vmul.f32 1.442695, %v733_v29  ;;  %v2704_v4 = vpop.f32.mrf.mxu0 }
 0x16c   : > { %v1895_v18 = vpop.eup %1894  ;;  %1105 = vst [vmem:[%s2646_s22 + $0x10] sm:$0xff] %v1041_v41  ;;  %v1042_v48 = vmul.f32 %v1893_v10, %v2520_v42  ;;  %v1649_v24 = vpack.c.bf16 %v1893_v10, %v1889_v2  ;;  %1920 = vpow2.f32 %v803_v56  ;;  %v875_v56 = vmul.f32 1.442695, %v765_v40  ;;  %v2706_v41 = vpop.f32.mrf.mxu1 }
 0x16d   : > { %v1897_v30 = vpop.eup %1896  ;;  %1137 = vst [vmem:[%s2646_s22 + $0x110] sm:$0xff] %v1073_v27  ;;  %v1074_v32 = vmul.f32 %v1895_v18, %v2597_v28  ;;  %v1665_v37 = vpack.c.bf16 %v1895_v18, %v1891_v6  ;;  %1922 = vpow2.f32 %v867_v57  ;;  %v873_v28 = vmul.f32 1.442695, %v764_v12  ;;  %v2708_v12 = vpop.f32.mrf.mxu0 }
 0x16e   : > { %v1899_v33 = vpop.eup %1898  ;;  %1106 = vst [vmem:[%s2646_s22 + $0x18] sm:$0xff] %v1042_v48  ;;  %1360 = vst [vmem:[%s2657_s24 + $0x8] sm:$0xff] %v1649_v24  ;;  %v1043_v42 = vmul.f32 %v1897_v30, %v2509_v38  ;;  %1924 = vpow2.f32 %v805_v31  ;;  %v2710_v48 = vpop.f32.mrf.mxu1 }
 0x16f   : > { %v1901_v47 = vpop.eup %1900  ;;  %1138 = vst [vmem:[%s2646_s22 + $0x118] sm:$0xff] %v1074_v32  ;;  %1376 = vst [vmem:[%s2657_s24 + $0x88] sm:$0xff] %v1665_v37  ;;  %v1075_v49 = vmul.f32 %v1899_v33, %v2588_v25  ;;  %1926 = vpow2.f32 %v869_v5  ;;  %v735_v32 = vsub.f32 0.0, %v2678_v51 }
 0x170   : > { %v1903_v52 = vpop.eup %1902  ;;  %1107 = vst [vmem:[%s2646_s22 + $0x20] sm:$0xff] %v1043_v42  ;;  %v1044_v38 = vmul.f32 %v1901_v47, %v2503_v35  ;;  %v1650_v45 = vpack.c.bf16 %v1901_v47, %v1897_v30  ;;  %1928 = vpow2.f32 %v807_v7  ;;  %v2714_v42 = vpop.f32.mrf.mxu0  ;;  %v736_v47 = vsub.f32 0.0, %v2692_v62 }
 0x171   : > { %v1905_v55 = vpop.eup %1904  ;;  %1139 = vst [vmem:[%s2646_s22 + $0x120] sm:$0xff] %v1075_v49  ;;  %v1076_v25 = vmul.f32 %v1903_v52, %v2578_v21  ;;  %v1666_v50 = vpack.c.bf16 %v1903_v52, %v1899_v33  ;;  %1930 = vpow2.f32 %v871_v11  ;;  %v877_v21 = vmul.f32 1.442695, %v766_v34  ;;  %v2717_v49 = vpop.f32.mrf.mxu1 }
 0x172   : > { %v1907_v58 = vpop.eup %1906  ;;  %1108 = vst [vmem:[%s2646_s22 + $0x28] sm:$0xff] %v1044_v38  ;;  %1361 = vst [vmem:[%s2657_s24 + $0x10] sm:$0xff] %v1650_v45  ;;  %v1045_v35 = vmul.f32 %v1905_v55, %v2512_v39  ;;  %1932 = vpow2.f32 %v809_v43  ;;  %v767_v33 = vsub.f32 0.0, %v2682_v54  ;;  %v768_v52 = vsub.f32 0.0, %v2696_v46  ;;  %v2104_v46 = vld [vmem:[%s2468_s30 + $0x40] sm:$0xff] }
 0x173   : > { %v1909_v61 = vpop.eup %1908  ;;  %1140 = vst [vmem:[%s2646_s22 + $0x128] sm:$0xff] %v1076_v25  ;;  %1377 = vst [vmem:[%s2657_s24 + $0x90] sm:$0xff] %v1666_v50  ;;  %v1077_v57 = vmul.f32 %v1907_v58, %v2591_v26  ;;  %1934 = vpow2.f32 %v873_v28  ;;  %v815_v45 = vmul.f32 1.442695, %v735_v32  ;;  %v769_v50 = vsub.f32 0.0, %v2706_v41 }
 0x174   : > { %v1911_v63 = vpop.eup %1910  ;;  %1109 = vst [vmem:[%s2646_s22 + $0x30] sm:$0xff] %v1045_v35  ;;  %v1046_v0 = vmul.f32 %v1909_v61, %v2506_v36  ;;  %v1651_v39 = vpack.c.bf16 %v1909_v61, %v1905_v55  ;;  %1936 = vpow2.f32 %v811_v53  ;;  %v737_v53 = vsub.f32 0.0, %v2704_v4 }
 0x175   : > { %v1913_v60 = vpop.eup %1912  ;;  %1141 = vst [vmem:[%s2646_s22 + $0x130] sm:$0xff] %v1077_v57  ;;  %v1078_v26 = vmul.f32 %v1911_v63, %v2581_v22  ;;  %v1667_v31 = vpack.c.bf16 %v1911_v63, %v1907_v58  ;;  %1938 = vpow2.f32 %v875_v56  ;;  %v879_v25 = vmul.f32 1.442695, %v767_v33  ;;  %v2722_v56 = vpop.f32.mrf.mxu0 }
 0x176   : > { %v1915_v1 = vpop.eup %1914  ;;  %1110 = vst [vmem:[%s2646_s22 + $0x38] sm:$0xff] %v1046_v0  ;;  %1362 = vst [vmem:[%s2657_s24 + $0x18] sm:$0xff] %v1651_v39  ;;  %v919_v2 = vadd.f32 1.0, %v1913_v60  ;;  %1940 = vpow2.f32 %v813_v59  ;;  %v817_v59 = vmul.f32 1.442695, %v736_v47  ;;  %v738_v61 = vsub.f32 0.0, %v2708_v12  ;;  %v2725_v57 = vpop.f32.mrf.mxu1 }
 0x177   : > { %v1917_v3 = vpop.eup %1916  ;;  %1142 = vst [vmem:[%s2646_s22 + $0x138] sm:$0xff] %v1078_v26  ;;  %1378 = vst [vmem:[%s2657_s24 + $0x98] sm:$0xff] %v1667_v31  ;;  %v951_v36 = vadd.f32 1.0, %v1915_v1  ;;  %1942 = vpow2.f32 %v877_v21  ;;  %v881_v63 = vmul.f32 1.442695, %v768_v52  ;;  %v770_v0 = vsub.f32 0.0, %v2710_v48  ;;  %v2732_v4 = vpop.f32.mrf.mxu0 }
 0x178   : > { %v1919_v5 = vpop.eup %1918  ;;  %1944 = vrcp.f32 %v919_v2  ;;  %v920_v6 = vadd.f32 1.0, %v1917_v3  ;;  %v819_v26 = vmul.f32 1.442695, %v737_v53  ;;  %v739_v31 = vsub.f32 0.0, %v2714_v42  ;;  %v2108_v52 = vld [vmem:[%s2468_s30 + $0x60] sm:$0xff] }
 0x179   : > { %v1921_v22 = vpop.eup %1920  ;;  %1946 = vrcp.f32 %v951_v36  ;;  %v952_v7 = vadd.f32 1.0, %v1919_v5  ;;  %v883_v3 = vmul.f32 1.442695, %v769_v50  ;;  %v771_v36 = vsub.f32 0.0, %v2717_v49  ;;  %v616_v32 = vpop.f32.mrf.mxu0 }
 0x17a   : > { %v1923_v8 = vpop.eup %1922  ;;  %1948 = vrcp.f32 %v920_v6  ;;  %v921_v10 = vadd.f32 1.0, %v1921_v22  ;;  %v2105_v6 = vld [vmem:[%s2468_s30 + $0x48] sm:$0xff]  ;;  %v823_v48 = vmul.f32 1.442695, %v739_v31 }
 0x17b   : > { %v1925_v27 = vpop.eup %1924  ;;  %1950 = vrcp.f32 %v952_v7  ;;  %v953_v11 = vadd.f32 1.0, %v1923_v8  ;;  %v821_v7 = vmul.f32 1.442695, %v738_v61  ;;  %v2736_v8 = vpop.f32.mrf.mxu1 }
 0x17c   : > { %v1927_v17 = vpop.eup %1926  ;;  %1952 = vrcp.f32 %v921_v10  ;;  %v922_v18 = vadd.f32 1.0, %v1925_v27 }
 0x17d   : > { %v1929_v24 = vpop.eup %1928  ;;  %1954 = vrcp.f32 %v953_v11  ;;  %v954_v29 = vadd.f32 1.0, %v1927_v17  ;;  %v885_v11 = vmul.f32 1.442695, %v770_v0  ;;  %v2106_v17 = vld [vmem:[%s2468_s30 + $0x50] sm:$0xff] }
 0x17e   : > { %v1931_v23 = vpop.eup %1930  ;;  %1956 = vrcp.f32 %v922_v18  ;;  %v923_v30 = vadd.f32 1.0, %v1929_v24  ;;  %v740_v24 = vsub.f32 0.0, %v2722_v56  ;;  %v2109_v56 = vld [vmem:[%s2468_s30 + $0x68] sm:$0xff]  ;;  %v2110_v0 = vld [vmem:[%s2468_s30 + $0x70] sm:$0xff] }
 0x17f   : > { %v1933_v37 = vpop.eup %1932  ;;  %1958 = vrcp.f32 %v954_v29  ;;  %v955_v40 = vadd.f32 1.0, %v1931_v23  ;;  %v887_v23 = vmul.f32 1.442695, %v771_v36 }
 0x180   : > { %v1935_v43 = vpop.eup %1934  ;;  %1960 = vrcp.f32 %v923_v30  ;;  %v924_v44 = vadd.f32 1.0, %v1933_v37  ;;  %v772_v30 = vsub.f32 0.0, %v2725_v57 }
 0x181   : > { %v1937_v28 = vpop.eup %1936  ;;  %1962 = vrcp.f32 %v955_v40  ;;  %v956_v34 = vadd.f32 1.0, %v1935_v43  ;;  %v2107_v40 = vld [vmem:[%s2468_s30 + $0x58] sm:$0xff]  ;;  %v741_v43 = vsub.f32 0.0, %v2732_v4 }
 0x182   : > { %v1939_v51 = vpop.eup %1938  ;;  %1964 = vrcp.f32 %v924_v44  ;;  %v925_v38 = vadd.f32 1.0, %v1937_v28  ;;  %v696_v44 = vpop.f32.mrf.mxu1  ;;  %v773_v28 = vsub.f32 0.0, %v2736_v8 }
 0x183   : > { %v1941_v54 = vpop.eup %1940  ;;  %1966 = vrcp.f32 %v956_v34  ;;  %v957_v55 = vadd.f32 1.0, %v1939_v51 }
 0x184   : > { %v1943_v58 = vpop.eup %1942  ;;  %1968 = vrcp.f32 %v925_v38  ;;  %v926_v35 = vadd.f32 1.0, %v1941_v54  ;;  %v825_v38 = vmul.f32 1.442695, %v740_v24  ;;  %v889_v54 = vmul.f32 1.442695, %v772_v30  ;;  %v2764_v61 = vpop.f32.mrf.mxu1 }
 0x185   : > { %v1945_v21 = vpop.eup %1944  ;;  %1970 = vrcp.f32 %v957_v55  ;;  %v958_v62 = vadd.f32 1.0, %v1943_v58  ;;  %v774_v55 = vsub.f32 0.0, %v696_v44 }
 0x186   : > { %v1947_v39 = vpop.eup %1946  ;;  %v1047_v60 = vmul.f32 %v2104_v46, %v1945_v21  ;;  %1972 = vrcp.f32 %v926_v35  ;;  %v2778_v4 = vpop.f32.mrf.mxu1 }
 0x187   : > { %v1949_v1 = vpop.eup %1948  ;;  %v1079_v2 = vmul.f32 %v1947_v39, %v2572_v19  ;;  %1974 = vrcp.f32 %v958_v62  ;;  %v891_v62 = vmul.f32 1.442695, %v773_v28 }
 0x188   : > { %v1951_v5 = vpop.eup %1950  ;;  %1111 = vst [vmem:[%s2646_s22 + $0x40] sm:$0xff] %v1047_v60  ;;  %v1048_v41 = vmul.f32 %v2105_v6, %v1949_v1  ;;  %v1652_v22 = vpack.c.bf16 %v1949_v1, %v1945_v21  ;;  %1976 = vpow2.f32 %v815_v45  ;;  %v742_v45 = vsub.f32 0.0, %v616_v32  ;;  %v2112_v6 = vld [vmem:[%s2468_s30 + $0x178] sm:$0xff] }
 0x189   : > { %v1953_v19 = vpop.eup %1952  ;;  %1143 = vst [vmem:[%s2646_s22 + $0x140] sm:$0xff] %v1079_v2  ;;  %v1080_v10 = vmul.f32 %v1951_v5, %v2562_v15  ;;  %v1668_v27 = vpack.c.bf16 %v1951_v5, %v1947_v39  ;;  %1978 = vpow2.f32 %v879_v25  ;;  %v2760_v25 = vpop.f32.mrf.mxu0  ;;  %v2111_v2 = vld [vmem:[%s2468_s30 + $0x78] sm:$0xff] }
 0x18a   : > { %v1955_v12 = vpop.eup %1954  ;;  %1112 = vst [vmem:[%s2646_s22 + $0x48] sm:$0xff] %v1048_v41  ;;  %1363 = vst [vmem:[%s2657_s24 + $0x20] sm:$0xff] %v1652_v22  ;;  %v1049_v18 = vmul.f32 %v2106_v17, %v1953_v19  ;;  %1980 = vpow2.f32 %v817_v59  ;;  %v827_v59 = vmul.f32 1.442695, %v741_v43  ;;  %v829_v46 = vmul.f32 1.442695, %v742_v45 }
 0x18b   : > { %v1957_v29 = vpop.eup %1956  ;;  %1144 = vst [vmem:[%s2646_s22 + $0x148] sm:$0xff] %v1080_v10  ;;  %1379 = vst [vmem:[%s2657_s24 + $0xa0] sm:$0xff] %v1668_v27  ;;  %v1081_v15 = vmul.f32 %v1955_v12, %v2575_v20  ;;  %1982 = vpow2.f32 %v881_v63  ;;  %v2774_v31 = vpop.f32.mrf.mxu0  ;;  %v743_v44 = vsub.f32 0.0, %v2760_v25 }
 0x18c   : > { %v1959_v37 = vpop.eup %1958  ;;  %1113 = vst [vmem:[%s2646_s22 + $0x50] sm:$0xff] %v1049_v18  ;;  %v1050_v33 = vmul.f32 %v2107_v40, %v1957_v29  ;;  %v1653_v42 = vpack.c.bf16 %v1957_v29, %v1953_v19  ;;  %1984 = vpow2.f32 %v819_v26 }
 0x18d   : > { %v1961_v47 = vpop.eup %1960  ;;  %1145 = vst [vmem:[%s2646_s22 + $0x150] sm:$0xff] %v1081_v15  ;;  %v1082_v20 = vmul.f32 %v1959_v37, %v2565_v16  ;;  %v1669_v49 = vpack.c.bf16 %v1959_v37, %v1955_v12  ;;  %1986 = vpow2.f32 %v883_v3  ;;  %v2786_v10 = vpop.f32.mrf.mxu0  ;;  %v831_v25 = vmul.f32 1.442695, %v743_v44  ;;  %v2119_v44 = vld [vmem:[%s2468_s30 + $0x98] sm:$0xff] }
 0x18e   : > { %v1963_v34 = vpop.eup %1962  ;;  %1114 = vst [vmem:[%s2646_s22 + $0x58] sm:$0xff] %v1050_v33  ;;  %1364 = vst [vmem:[%s2657_s24 + $0x28] sm:$0xff] %v1653_v42  ;;  %v1051_v51 = vmul.f32 %v2108_v52, %v1961_v47  ;;  %1988 = vpow2.f32 %v821_v7  ;;  %v2788_v12 = vpop.f32.mrf.mxu1 }
 0x18f   : > { %v1965_v53 = vpop.eup %1964  ;;  %1146 = vst [vmem:[%s2646_s22 + $0x158] sm:$0xff] %v1082_v20  ;;  %1380 = vst [vmem:[%s2657_s24 + $0xa8] sm:$0xff] %v1669_v49  ;;  %v1083_v16 = vmul.f32 %v1963_v34, %v2556_v13  ;;  %1990 = vpow2.f32 %v885_v11  ;;  %v775_v49 = vsub.f32 0.0, %v2764_v61 }
 0x190   : > { %v1967_v50 = vpop.eup %1966  ;;  %1115 = vst [vmem:[%s2646_s22 + $0x60] sm:$0xff] %v1051_v51  ;;  %v1052_v58 = vmul.f32 %v2109_v56, %v1965_v53  ;;  %v1654_v35 = vpack.c.bf16 %v1965_v53, %v1961_v47  ;;  %1992 = vpow2.f32 %v823_v48  ;;  %v2792_v37 = vpop.f32.mrf.mxu1  ;;  %v744_v51 = vsub.f32 0.0, %v2774_v31 }
 0x191   : > { %v1969_v13 = vpop.eup %1968  ;;  %1147 = vst [vmem:[%s2646_s22 + $0x160] sm:$0xff] %v1083_v16  ;;  %v1084_v57 = vmul.f32 %v1967_v50, %v2551_v9  ;;  %v1670_v21 = vpack.c.bf16 %v1967_v50, %v1963_v34  ;;  %1994 = vpow2.f32 %v887_v23  ;;  %v893_v9 = vmul.f32 1.442695, %v774_v55  ;;  %v2790_v23 = vpop.f32.mrf.mxu0 }
 0x192   : > { %v1971_v63 = vpop.eup %1970  ;;  %1116 = vst [vmem:[%s2646_s22 + $0x68] sm:$0xff] %v1052_v58  ;;  %1365 = vst [vmem:[%s2657_s24 + $0x30] sm:$0xff] %v1654_v35  ;;  %v1053_v39 = vmul.f32 %v2110_v0, %v1969_v13  ;;  %1996 = vpow2.f32 %v825_v38  ;;  %v2799_v38 = vpop.f32.mrf.mxu1  ;;  %v776_v16 = vsub.f32 0.0, %v2778_v4  ;;  %v745_v50 = vsub.f32 0.0, %v2786_v10 }
 0x193   : > { %v1973_v60 = vpop.eup %1972  ;;  %1148 = vst [vmem:[%s2646_s22 + $0x168] sm:$0xff] %v1084_v57  ;;  %1381 = vst [vmem:[%s2657_s24 + $0xb0] sm:$0xff] %v1670_v21  ;;  %v1085_v26 = vmul.f32 %v1971_v63, %v2559_v14  ;;  %1998 = vpow2.f32 %v889_v54  ;;  %v2796_v28 = vpop.f32.mrf.mxu0  ;;  %v895_v35 = vmul.f32 1.442695, %v775_v49  ;;  %v833_v21 = vmul.f32 1.442695, %v744_v51 }
 0x194   : > { %v1975_v1 = vpop.eup %1974  ;;  %1117 = vst [vmem:[%s2646_s22 + $0x70] sm:$0xff] %v1053_v39  ;;  %v1054_v3 = vmul.f32 %v2111_v2, %v1973_v60  ;;  %v1655_v36 = vpack.c.bf16 %v1973_v60, %v1969_v13  ;;  %2000 = vpow2.f32 %v827_v59  ;;  %v777_v59 = vsub.f32 0.0, %v2788_v12 }
 0x195   : > { %v1977_v5 = vpop.eup %1976  ;;  %1149 = vst [vmem:[%s2646_s22 + $0x170] sm:$0xff] %v1085_v26  ;;  %v1086_v14 = vmul.f32 %v2112_v6, %v1975_v1  ;;  %v1671_v41 = vpack.c.bf16 %v1975_v1, %v1971_v63  ;;  %2002 = vpow2.f32 %v891_v62  ;;  %v2804_v61 = vpop.f32.mrf.mxu0  ;;  %v746_v62 = vsub.f32 0.0, %v2790_v23 }
 0x196   : > { %v1979_v22 = vpop.eup %1978  ;;  %1118 = vst [vmem:[%s2646_s22 + $0x78] sm:$0xff] %v1054_v3  ;;  %1366 = vst [vmem:[%s2657_s24 + $0x38] sm:$0xff] %v1655_v36  ;;  %v927_v7 = vadd.f32 1.0, %v1977_v5  ;;  %2004 = vpow2.f32 %v829_v46  ;;  %v2807_v63 = vpop.f32.mrf.mxu1  ;;  %v897_v46 = vmul.f32 1.442695, %v776_v16  ;;  %v778_v60 = vsub.f32 0.0, %v2792_v37 }
 0x197   : > { %v1981_v8 = vpop.eup %1980  ;;  %1150 = vst [vmem:[%s2646_s22 + $0x178] sm:$0xff] %v1086_v14  ;;  %1382 = vst [vmem:[%s2657_s24 + $0xb8] sm:$0xff] %v1671_v41  ;;  %v959_v19 = vadd.f32 1.0, %v1979_v22  ;;  %2006 = vpow2.f32 %v893_v9  ;;  %v2113_v9 = vld [vmem:[%s2468_s30 + $0x80] sm:$0xff]  ;;  %v835_v1 = vmul.f32 1.442695, %v745_v50  ;;  %v2814_v14 = vpop.f32.mrf.mxu0 }
 0x198   : > { %v1983_v27 = vpop.eup %1982  ;;  %2008 = vrcp.f32 %v927_v7  ;;  %v928_v11 = vadd.f32 1.0, %v1981_v8  ;;  %v747_v2 = vsub.f32 0.0, %v2796_v28  ;;  %v2114_v36 = vld [vmem:[%s2468_s30 + $0x180] sm:$0xff]  ;;  %v899_v5 = vmul.f32 1.442695, %v777_v59  ;;  %v2115_v22 = vld [vmem:[%s2468_s30 + $0x88] sm:$0xff]  ;;  %v2818_v10 = vpop.f32.mrf.mxu1 }
 0x199   : > { %v1985_v17 = vpop.eup %1984  ;;  %2010 = vrcp.f32 %v959_v19  ;;  %v960_v18 = vadd.f32 1.0, %v1983_v27  ;;  %v779_v6 = vsub.f32 0.0, %v2799_v38  ;;  %v837_v19 = vmul.f32 1.442695, %v746_v62  ;;  %v2121_v16 = vld [vmem:[%s2468_s30 + $0xa0] sm:$0xff] }
 0x19a   : > { %v1987_v48 = vpop.eup %1986  ;;  %2012 = vrcp.f32 %v928_v11  ;;  %v929_v24 = vadd.f32 1.0, %v1985_v17  ;;  %v2116_v11 = vld [vmem:[%s2468_s30 + $0x188] sm:$0xff]  ;;  %v748_v23 = vsub.f32 0.0, %v2804_v61  ;;  %v749_v49 = vsub.f32 0.0, %v2814_v14  ;;  %v716_v28 = vpop.f32.mrf.mxu1 }
 0x19b   : > { %v1989_v29 = vpop.eup %1988  ;;  %2014 = vrcp.f32 %v960_v18  ;;  %v961_v15 = vadd.f32 1.0, %v1987_v48  ;;  %v901_v18 = vmul.f32 1.442695, %v778_v60  ;;  %v782_v59 = vsub.f32 0.0, %v716_v28 }
 0x19c   : > { %v1991_v30 = vpop.eup %1990  ;;  %2016 = vrcp.f32 %v929_v24  ;;  %v930_v32 = vadd.f32 1.0, %v1989_v29  ;;  %v2117_v24 = vld [vmem:[%s2468_s30 + $0x90] sm:$0xff]  ;;  %v843_v62 = vmul.f32 1.442695, %v749_v49 }
 0x19d   : > { %v1993_v40 = vpop.eup %1992  ;;  %2018 = vrcp.f32 %v961_v15  ;;  %v962_v33 = vadd.f32 1.0, %v1991_v30  ;;  %v839_v15 = vmul.f32 1.442695, %v747_v2 }
 0x19e   : > { %v1995_v42 = vpop.eup %1994  ;;  %2020 = vrcp.f32 %v930_v32  ;;  %v931_v43 = vadd.f32 1.0, %v1993_v40  ;;  %v2118_v32 = vld [vmem:[%s2468_s30 + $0x190] sm:$0xff]  ;;  %v903_v40 = vmul.f32 1.442695, %v779_v6  ;;  %v2127_v6 = vld [vmem:[%s2468_s30 + $0xb8] sm:$0xff] }
 0x19f   : > { %v1997_v47 = vpop.eup %1996  ;;  %2022 = vrcp.f32 %v962_v33  ;;  %v963_v20 = vadd.f32 1.0, %v1995_v42  ;;  %v780_v33 = vsub.f32 0.0, %v2807_v63  ;;  %v636_v42 = vpop.f32.mrf.mxu0 }
 0x1a0   : > { %v1999_v34 = vpop.eup %1998  ;;  %2024 = vrcp.f32 %v931_v43  ;;  %v932_v52 = vadd.f32 1.0, %v1997_v47 }
 0x1a1   : > { %v2001_v45 = vpop.eup %2000  ;;  %2026 = vrcp.f32 %v963_v20  ;;  %v964_v53 = vadd.f32 1.0, %v1999_v34 }
 0x1a2   : > { %v2003_v54 = vpop.eup %2002  ;;  %2028 = vrcp.f32 %v932_v52  ;;  %v933_v55 = vadd.f32 1.0, %v2001_v45  ;;  %v2120_v52 = vld [vmem:[%s2468_s30 + $0x198] sm:$0xff]  ;;  %v781_v45 = vsub.f32 0.0, %v2818_v10 }
 0x1a3   : > { %v2005_v56 = vpop.eup %2004  ;;  %2030 = vrcp.f32 %v964_v53  ;;  %v965_v58 = vadd.f32 1.0, %v2003_v54 }
 0x1a4   : > { %v2007_v13 = vpop.eup %2006  ;;  %2032 = vrcp.f32 %v933_v55  ;;  %v934_v57 = vadd.f32 1.0, %v2005_v56  ;;  %v841_v55 = vmul.f32 1.442695, %v748_v23  ;;  %v2122_v56 = vld [vmem:[%s2468_s30 + $0x1a0] sm:$0xff]  ;;  %v907_v60 = vmul.f32 1.442695, %v781_v45 }
 0x1a5   : > { %v2009_v0 = vpop.eup %2008  ;;  %2034 = vrcp.f32 %v965_v58  ;;  %v966_v39 = vadd.f32 1.0, %v2007_v13  ;;  %v2123_v13 = vld [vmem:[%s2468_s30 + $0xa8] sm:$0xff] }
 0x1a6   : > { %v2011_v26 = vpop.eup %2010  ;;  %v1055_v31 = vmul.f32 %v2113_v9, %v2009_v0  ;;  %2036 = vrcp.f32 %v934_v57  ;;  %v2125_v9 = vld [vmem:[%s2468_s30 + $0xb0] sm:$0xff] }
 0x1a7   : > { %v2013_v3 = vpop.eup %2012  ;;  %v1087_v4 = vmul.f32 %v2114_v36, %v2011_v26  ;;  %2038 = vrcp.f32 %v966_v39 }
 0x1a8   : > { %v2015_v41 = vpop.eup %2014  ;;  %1119 = vst [vmem:[%s2646_s22 + $0x80] sm:$0xff] %v1055_v31  ;;  %v1056_v7 = vmul.f32 %v2115_v22, %v2013_v3  ;;  %v1656_v8 = vpack.c.bf16 %v2013_v3, %v2009_v0  ;;  %2040 = vpow2.f32 %v831_v25  ;;  %v750_v25 = vsub.f32 0.0, %v636_v42  ;;  %v2124_v0 = vld [vmem:[%s2468_s30 + $0x1a8] sm:$0xff]  ;;  %v2126_v3 = vld [vmem:[%s2468_s30 + $0x1b0] sm:$0xff] }
 0x1a9   : > { %v2017_v27 = vpop.eup %2016  ;;  %1151 = vst [vmem:[%s2646_s22 + $0x180] sm:$0xff] %v1087_v4  ;;  %v1088_v12 = vmul.f32 %v2116_v11, %v2015_v41  ;;  %v1672_v17 = vpack.c.bf16 %v2015_v41, %v2011_v26  ;;  %2042 = vpow2.f32 %v895_v35  ;;  %v905_v35 = vmul.f32 1.442695, %v780_v33 }
 0x1aa   : > { %v2019_v48 = vpop.eup %2018  ;;  %1120 = vst [vmem:[%s2646_s22 + $0x88] sm:$0xff] %v1056_v7  ;;  %1367 = vst [vmem:[%s2657_s24 + $0x40] sm:$0xff] %v1656_v8  ;;  %v1057_v29 = vmul.f32 %v2117_v24, %v2017_v27  ;;  %2044 = vpow2.f32 %v833_v21  ;;  %v909_v4 = vmul.f32 1.442695, %v782_v59  ;;  %v2128_v7 = vld [vmem:[%s2468_s30 + $0x1b8] sm:$0xff] }
 0x1ab   : > { %v2021_v30 = vpop.eup %2020  ;;  %1152 = vst [vmem:[%s2646_s22 + $0x188] sm:$0xff] %v1088_v12  ;;  %1383 = vst [vmem:[%s2657_s24 + $0xc0] sm:$0xff] %v1672_v17  ;;  %v1089_v37 = vmul.f32 %v2118_v32, %v2019_v48  ;;  %2046 = vpow2.f32 %v897_v46 }
 0x1ac   : > { %v2023_v43 = vpop.eup %2022  ;;  %1121 = vst [vmem:[%s2646_s22 + $0x90] sm:$0xff] %v1057_v29  ;;  %v1058_v47 = vmul.f32 %v2119_v44, %v2021_v30  ;;  %v1657_v20 = vpack.c.bf16 %v2021_v30, %v2017_v27  ;;  %2048 = vpow2.f32 %v835_v1  ;;  %v845_v1 = vmul.f32 1.442695, %v750_v25 }
 0x1ad   : > { %v2025_v34 = vpop.eup %2024  ;;  %1153 = vst [vmem:[%s2646_s22 + $0x190] sm:$0xff] %v1089_v37  ;;  %v1090_v51 = vmul.f32 %v2120_v52, %v2023_v43  ;;  %v1673_v38 = vpack.c.bf16 %v2023_v43, %v2019_v48  ;;  %2050 = vpow2.f32 %v899_v5 }
 0x1ae   : > { %v2027_v53 = vpop.eup %2026  ;;  %1122 = vst [vmem:[%s2646_s22 + $0x98] sm:$0xff] %v1058_v47  ;;  %1368 = vst [vmem:[%s2657_s24 + $0x48] sm:$0xff] %v1657_v20  ;;  %v1059_v54 = vmul.f32 %v2121_v16, %v2025_v34  ;;  %2052 = vpow2.f32 %v837_v19 }
 0x1af   : > { %v2029_v50 = vpop.eup %2028  ;;  %1154 = vst [vmem:[%s2646_s22 + $0x198] sm:$0xff] %v1090_v51  ;;  %1384 = vst [vmem:[%s2657_s24 + $0xc8] sm:$0xff] %v1673_v38  ;;  %v1091_v58 = vmul.f32 %v2122_v56, %v2027_v53  ;;  %2054 = vpow2.f32 %v901_v18 }
 0x1b0   : > { %v2031_v61 = vpop.eup %2030  ;;  %1123 = vst [vmem:[%s2646_s22 + $0xa0] sm:$0xff] %v1059_v54  ;;  %v1060_v57 = vmul.f32 %v2123_v13, %v2029_v50  ;;  %v1658_v21 = vpack.c.bf16 %v2029_v50, %v2025_v34  ;;  %2056 = vpow2.f32 %v839_v15  ;;  %v2129_v50 = vld [vmem:[%s2468_s30 + $0xc0] sm:$0xff]  ;;  %v2131_v13 = vld [vmem:[%s2468_s30 + $0xc8] sm:$0xff] }
 0x1b1   : > { %v2033_v63 = vpop.eup %2032  ;;  %1155 = vst [vmem:[%s2646_s22 + $0x1a0] sm:$0xff] %v1091_v58  ;;  %v1092_v39 = vmul.f32 %v2124_v0, %v2031_v61  ;;  %v1674_v46 = vpack.c.bf16 %v2031_v61, %v2027_v53  ;;  %2058 = vpow2.f32 %v903_v40 }
 0x1b2   : > { %v2035_v26 = vpop.eup %2034  ;;  %1124 = vst [vmem:[%s2646_s22 + $0xa8] sm:$0xff] %v1060_v57  ;;  %1369 = vst [vmem:[%s2657_s24 + $0x50] sm:$0xff] %v1658_v21  ;;  %v1061_v31 = vmul.f32 %v2125_v9, %v2033_v63  ;;  %2060 = vpow2.f32 %v841_v55 }
 0x1b3   : > { %v2037_v2 = vpop.eup %2036  ;;  %1156 = vst [vmem:[%s2646_s22 + $0x1a8] sm:$0xff] %v1092_v39  ;;  %1385 = vst [vmem:[%s2657_s24 + $0xd0] sm:$0xff] %v1674_v46  ;;  %v1093_v36 = vmul.f32 %v2126_v3, %v2035_v26  ;;  %2062 = vpow2.f32 %v905_v35  ;;  %v2130_v35 = vld [vmem:[%s2468_s30 + $0x1c0] sm:$0xff]  ;;  %v2135_v3 = vld [vmem:[%s2468_s30 + $0xd8] sm:$0xff] }
 0x1b4   : > { %v2039_v5 = vpop.eup %2038  ;;  %1125 = vst [vmem:[%s2646_s22 + $0xb0] sm:$0xff] %v1061_v31  ;;  %v1062_v14 = vmul.f32 %v2127_v6, %v2037_v2  ;;  %v1659_v41 = vpack.c.bf16 %v2037_v2, %v2033_v63  ;;  %2064 = vpow2.f32 %v843_v62  ;;  %v2132_v63 = vld [vmem:[%s2468_s30 + $0x1c8] sm:$0xff]  ;;  %v2134_v31 = vld [vmem:[%s2468_s30 + $0x1d0] sm:$0xff]  ;;  %v2136_v6 = vld [vmem:[%s2468_s30 + $0x1d8] sm:$0xff] }
 0x1b5   : > { %v2041_v22 = vpop.eup %2040  ;;  %1157 = vst [vmem:[%s2646_s22 + $0x1b0] sm:$0xff] %v1093_v36  ;;  %v1094_v8 = vmul.f32 %v2128_v7, %v2039_v5  ;;  %v1675_v19 = vpack.c.bf16 %v2039_v5, %v2035_v26  ;;  %2066 = vpow2.f32 %v907_v60  ;;  %v2133_v60 = vld [vmem:[%s2468_s30 + $0xd0] sm:$0xff]  ;;  %v2137_v7 = vld [vmem:[%s2468_s30 + $0xe0] sm:$0xff] }
 0x1b6   : > { %v2043_v10 = vpop.eup %2042  ;;  %1126 = vst [vmem:[%s2646_s22 + $0xb8] sm:$0xff] %v1062_v14  ;;  %1370 = vst [vmem:[%s2657_s24 + $0x58] sm:$0xff] %v1659_v41  ;;  %v935_v27 = vadd.f32 1.0, %v2041_v22  ;;  %2068 = vpow2.f32 %v845_v1 }
 0x1b7   : > { %v2045_v11 = vpop.eup %2044  ;;  %1158 = vst [vmem:[%s2646_s22 + $0x1b8] sm:$0xff] %v1094_v8  ;;  %1386 = vst [vmem:[%s2657_s24 + $0xd8] sm:$0xff] %v1675_v19  ;;  %v967_v12 = vadd.f32 1.0, %v2043_v10  ;;  %2070 = vpow2.f32 %v909_v4  ;;  %v2138_v10 = vld [vmem:[%s2468_s30 + $0x1e0] sm:$0xff] }
 0x1b8   : > { %v2047_v17 = vpop.eup %2046  ;;  %2072 = vrcp.f32 %v935_v27  ;;  %v936_v18 = vadd.f32 1.0, %v2045_v11 }
 0x1b9   : > { %v2049_v48 = vpop.eup %2048  ;;  %2074 = vrcp.f32 %v967_v12  ;;  %v968_v24 = vadd.f32 1.0, %v2047_v17  ;;  %v2139_v12 = vld [vmem:[%s2468_s30 + $0xe8] sm:$0xff] }
 0x1ba   : > { %v2051_v29 = vpop.eup %2050  ;;  %2076 = vrcp.f32 %v936_v18  ;;  %v937_v15 = vadd.f32 1.0, %v2049_v48 }
 0x1bb   : > { %v2053_v23 = vpop.eup %2052  ;;  %2078 = vrcp.f32 %v968_v24  ;;  %v969_v30 = vadd.f32 1.0, %v2051_v29  ;;  %v2140_v24 = vld [vmem:[%s2468_s30 + $0x1e8] sm:$0xff] }
 0x1bc   : > { %v2055_v32 = vpop.eup %2054  ;;  %2080 = vrcp.f32 %v937_v15  ;;  %v938_v37 = vadd.f32 1.0, %v2053_v23 }
 0x1bd   : > { %v2057_v40 = vpop.eup %2056  ;;  %2082 = vrcp.f32 %v969_v30  ;;  %v970_v33 = vadd.f32 1.0, %v2055_v32  ;;  %v2141_v30 = vld [vmem:[%s2468_s30 + $0xf0] sm:$0xff] }
 0x1be   : > { %v2059_v42 = vpop.eup %2058  ;;  %2084 = vrcp.f32 %v938_v37  ;;  %v939_v43 = vadd.f32 1.0, %v2057_v40  ;;  %v2142_v40 = vld [vmem:[%s2468_s30 + $0x1f0] sm:$0xff] }
 0x1bf   : > { %v2061_v44 = vpop.eup %2060  ;;  %2086 = vrcp.f32 %v970_v33  ;;  %v971_v47 = vadd.f32 1.0, %v2059_v42 }
 0x1c0   : > { %v2063_v20 = vpop.eup %2062  ;;  %2088 = vrcp.f32 %v939_v43  ;;  %v940_v49 = vadd.f32 1.0, %v2061_v44  ;;  %v2143_v43 = vld [vmem:[%s2468_s30 + $0xf8] sm:$0xff] }
 0x1c1   : > { %v2065_v28 = vpop.eup %2064  ;;  %2090 = vrcp.f32 %v971_v47  ;;  %v972_v34 = vadd.f32 1.0, %v2063_v20  ;;  %v2144_v20 = vld [vmem:[%s2468_s30 + $0x1f8] sm:$0xff]  ;;  %s2203_s30 = sshll.u32 %s2321_s27, 4  ;;  %s2204_s30 = int_to_ptr.vmem [resolvable:$false] %s2203_s30 }
 0x1c2   : > { %v2067_v52 = vpop.eup %2066  ;;  %2092 = vrcp.f32 %v940_v49  ;;  %v941_v51 = vadd.f32 1.0, %v2065_v28  ;;  %s2205_s20 = scalar_lea.vmem %s2204_s30, 16384  ;;  %p2206_p0 = scmp.lt.s32.totalorder %s2901_s4, %s2204_s30 }
 0x1c3   : > { %v2069_v38 = vpop.eup %2068  ;;  %2094 = vrcp.f32 %v972_v34  ;;  %v973_v45 = vadd.f32 1.0, %v2067_v52  ;;  %p2207_p2 = scmp.lt.s32.totalorder %s2205_s20, %s2199_s26 }
 0x1c4   : > { %v2071_v53 = vpop.eup %2070  ;;  %2096 = vrcp.f32 %v941_v51  ;;  %v942_v16 = vadd.f32 1.0, %v2069_v38 }
 0x1c5   : > { %v2073_v54 = vpop.eup %2072  ;;  %2098 = vrcp.f32 %v973_v45  ;;  %v974_v55 = vadd.f32 1.0, %v2071_v53  ;;  %p2208_p3 = por %p2207_p2, %p2206_p0 }
 0x1c6   : > { %v2075_v25 = vpop.eup %2074  ;;  %v1063_v56 = vmul.f32 %v2129_v50, %v2073_v54  ;;  %2100 = vrcp.f32 %v942_v16 }
 0x1c7   : > { %v2077_v58 = vpop.eup %2076  ;;  %v1095_v59 = vmul.f32 %v2130_v35, %v2075_v25  ;;  %2102 = vrcp.f32 %v974_v55  ;;  %p2209_p5 = pnand %p2208_p3, %p2202_p12 }
 0x1c8   : > { %v2079_v61 = vpop.eup %2078  ;;  %1127 = vst [vmem:[%s2646_s22 + $0xc0] sm:$0xff] %v1063_v56  ;;  %v1064_v57 = vmul.f32 %v2131_v13, %v2077_v58  ;;  %v1660_v21 = vpack.c.bf16 %v2077_v58, %v2073_v54 }
 0x1c9   : > { %v2081_v62 = vpop.eup %2080  ;;  %1159 = vst [vmem:[%s2646_s22 + $0x1c0] sm:$0xff] %v1095_v59  ;;  %v1096_v0 = vmul.f32 %v2132_v63, %v2079_v61  ;;  %v1676_v39 = vpack.c.bf16 %v2079_v61, %v2075_v25 }
 0x1ca   : > { %v2083_v46 = vpop.eup %2082  ;;  %1128 = vst [vmem:[%s2646_s22 + $0xc8] sm:$0xff] %v1064_v57  ;;  %1371 = vst [vmem:[%s2657_s24 + $0x60] sm:$0xff] %v1660_v21  ;;  %v1065_v26 = vmul.f32 %v2133_v60, %v2081_v62 }
 0x1cb   : > { %v2085_v9 = vpop.eup %2084  ;;  %1160 = vst [vmem:[%s2646_s22 + $0x1c8] sm:$0xff] %v1096_v0  ;;  %1387 = vst [vmem:[%s2657_s24 + $0xe0] sm:$0xff] %v1676_v39  ;;  %v1097_v1 = vmul.f32 %v2134_v31, %v2083_v46 }
 0x1cc   : > { %v2087_v2 = vpop.eup %2086  ;;  %1129 = vst [vmem:[%s2646_s22 + $0xd0] sm:$0xff] %v1065_v26  ;;  %v1066_v36 = vmul.f32 %v2135_v3, %v2085_v9  ;;  %v1661_v4 = vpack.c.bf16 %v2085_v9, %v2081_v62 }
 0x1cd   : > { %v2089_v5 = vpop.eup %2088  ;;  %1161 = vst [vmem:[%s2646_s22 + $0x1d0] sm:$0xff] %v1097_v1  ;;  %v1098_v14 = vmul.f32 %v2136_v6, %v2087_v2  ;;  %v1677_v41 = vpack.c.bf16 %v2087_v2, %v2083_v46 }
 0x1ce   : > { %v2091_v22 = vpop.eup %2090  ;;  %1130 = vst [vmem:[%s2646_s22 + $0xd8] sm:$0xff] %v1066_v36  ;;  %1372 = vst [vmem:[%s2657_s24 + $0x68] sm:$0xff] %v1661_v4  ;;  %v1067_v8 = vmul.f32 %v2137_v7, %v2089_v5 }
 0x1cf   : > { %v2093_v19 = vpop.eup %2092  ;;  %1162 = vst [vmem:[%s2646_s22 + $0x1d8] sm:$0xff] %v1098_v14  ;;  %1388 = vst [vmem:[%s2657_s24 + $0xe8] sm:$0xff] %v1677_v41  ;;  %v1099_v27 = vmul.f32 %v2138_v10, %v2091_v22 }
 0x1d0   : > { %v2095_v11 = vpop.eup %2094  ;;  %1131 = vst [vmem:[%s2646_s22 + $0xe0] sm:$0xff] %v1067_v8  ;;  %v1068_v17 = vmul.f32 %v2139_v12, %v2093_v19  ;;  %v1662_v18 = vpack.c.bf16 %v2093_v19, %v2089_v5 }
 0x1d1   : > { %v2097_v48 = vpop.eup %2096  ;;  %1163 = vst [vmem:[%s2646_s22 + $0x1e0] sm:$0xff] %v1099_v27  ;;  %v1100_v29 = vmul.f32 %v2140_v24, %v2095_v11  ;;  %v1678_v15 = vpack.c.bf16 %v2095_v11, %v2091_v22 }
 0x1d2   : > { %v2099_v23 = vpop.eup %2098  ;;  %1132 = vst [vmem:[%s2646_s22 + $0xe8] sm:$0xff] %v1068_v17  ;;  %1373 = vst [vmem:[%s2657_s24 + $0x70] sm:$0xff] %v1662_v18  ;;  %v1069_v32 = vmul.f32 %v2141_v30, %v2097_v48 }
 0x1d3   : > { %v2101_v37 = vpop.eup %2100  ;;  %1164 = vst [vmem:[%s2646_s22 + $0x1e8] sm:$0xff] %v1100_v29  ;;  %1389 = vst [vmem:[%s2657_s24 + $0xf0] sm:$0xff] %v1678_v15  ;;  %v1101_v33 = vmul.f32 %v2142_v40, %v2099_v23 }
 0x1d4   : > { %v2103_v42 = vpop.eup %2102  ;;  %1133 = vst [vmem:[%s2646_s22 + $0xf0] sm:$0xff] %v1069_v32  ;;  %v1070_v44 = vmul.f32 %v2143_v43, %v2101_v37  ;;  %v1663_v47 = vpack.c.bf16 %v2101_v37, %v2097_v48 }
 0x1d5   : > { %1165 = vst [vmem:[%s2646_s22 + $0x1f0] sm:$0xff] %v1101_v33  ;;  %v1102_v49 = vmul.f32 %v2144_v20, %v2103_v42  ;;  %v1679_v28 = vpack.c.bf16 %v2103_v42, %v2099_v23 }
 0x1d6   : > { %1134 = vst [vmem:[%s2646_s22 + $0xf8] sm:$0xff] %v1070_v44  ;;  %1374 = vst [vmem:[%s2657_s24 + $0x78] sm:$0xff] %v1663_v47 }
 0x1d7   : > { %1166 = vst [vmem:[%s2646_s22 + $0x1f8] sm:$0xff] %v1102_v49  ;;  %1390 = vst [vmem:[%s2657_s24 + $0xf8] sm:$0xff] %v1679_v28 }
 0x1d8   : > { %2212 = shalt.err (!%p2209_p5)
}
 0x1d9   : > { %s2213_s22 = scalar_lea.hbm %s2891_s6, 8192  ;;  %s2217_s21 = scalar_lea.hbm %s2989_s2, 16384 }
 0x1da   : > { %p2214_p7 = scmp.ne.s32.totalorder %s2891_s6, %s2213_s22  ;;  %p2218_p9 = scmp.lt.s32.totalorder %s2891_s6, %s2989_s2 }
 0x1db   : > { %p2219_p11 = scmp.lt.s32.totalorder %s2217_s21, %s2213_s22 }
 0x1dc   : > { %p2215_p6 = pnand %p2214_p7, %p2434_p13 }
 0x1dd   : > { %p2220_p10 = por %p2219_p11, %p2218_p9 }
 0x1de   : > { %p2216_p4 = pneg %p2215_p6 }
 0x1e0   : > { %p2221_p1 = pnand %p2220_p10, %p2216_p4 }
 0x1e2   : > { %2224 = shalt.err (!%p2221_p1)
}
 0x1e3   : > { %s2322_s15 = smov 256   ;;  %s2323_s25 = smov 16  }
 0x1e4   : > { %1720 = dma.vmem_to_hbm [thread:$0]  (%p2434_p13), %s2901_s4, 8192, %s2891_s6, %s1392_s18, %s2322_s15, %s2322_s15, %s2323_s25  }
 0x1e5   : > { %s1397_s26 = scalar_lea.sflag [#allocation9], %s2462_s11  ;;  %s2225_s27 = scalar_lea.vmem %s2912_s10, 4096 }
 0x1e6   : > { %p2226_p8 = scmp.ne.s32.totalorder %s2912_s10, %s2225_s27  ;;  %s2324_s30 = smov [#allocation8]  }
 0x1e7   : > { %s2229_s20 = sshll.u32 %s2324_s30, 4  ;;  %s2230_s20 = int_to_ptr.vmem [resolvable:$false] %s2229_s20 }
 0x1e8   : > { %p2227_p12 = pnand %p2226_p8, %p2434_p13  ;;  %s2231_s22 = scalar_lea.vmem %s2230_s20, 8192 }
 0x1e9   : > { %p2232_p2 = scmp.lt.s32.totalorder %s2912_s10, %s2230_s20  ;;  %p2233_p3 = scmp.lt.s32.totalorder %s2231_s22, %s2225_s27 }
 0x1ea   : > { %p2228_p0 = pneg %p2227_p12 }
 0x1eb   : > { %p2234_p5 = por %p2233_p3, %p2232_p2 }
 0x1ed   : > { %p2235_p7 = pnand %p2234_p5, %p2228_p0 }
 0x1ef   : > { %2238 = shalt.err (!%p2235_p7)
}
 0x1f0   : > { %s2239_s4 = scalar_lea.hbm %s2910_s8, 4096  ;;  %s2243_s24 = scalar_lea.hbm %s2990_s3, 8192 }
 0x1f1   : > { %p2240_p6 = scmp.ne.s32.totalorder %s2910_s8, %s2239_s4  ;;  %p2244_p11 = scmp.lt.s32.totalorder %s2910_s8, %s2990_s3 }
 0x1f2   : > { %p2245_p10 = scmp.lt.s32.totalorder %s2243_s24, %s2239_s4 }
 0x1f3   : > { %p2241_p4 = pnand %p2240_p6, %p2434_p13 }
 0x1f4   : > { %p2246_p1 = por %p2245_p10, %p2244_p11 }
 0x1f5   : > { %p2242_p9 = pneg %p2241_p4 }
 0x1f7   : > { %p2247_p8 = pnand %p2246_p1, %p2242_p9 }
 0x1f9   : > { %2250 = shalt.err (!%p2247_p8)
}
 0x1fa   : > { %s2325_s5 = smov 128   ;;  %s2326_s7 = smov 8  }
 0x1fb   : > { %1721 = dma.vmem_to_hbm [thread:$0]  (%p2434_p13), %s2912_s10, 4096, %s2910_s8, %s1397_s26, %s2325_s5, %s2325_s5, %s2326_s7  }
 0x1fc PF: > { %s1445_s15 = sand.u32 1, %s2293_s12   ;;  %p3002_p12 = scmp.ne.s32.totalorder %s2995_s23, 0 }
 0x1fd   : > { %p3003_p0 = scmp.ge.s32.totalorder %s2313_s17, 2  ;;  %s1446_s25 = scalar_lea.sflag [#allocation4], %s1445_s15 }
 0x1ff   : > { %p1733_p2 = pnand %p3003_p0, %p3002_p12 }
 0x201   : > { %p1734_p3 = pneg %p1733_p2 }
 0x203   : > { %2284 = dma.done.wait (%p1734_p3), %s1446_s25, 8192  }
 0x204   : > { %2286 = vsyncadd (%p1734_p3), %s1446_s25, 4294959104  ;;  %s1455_s27 = scalar_lea.sflag [#allocation9], %s1445_s15 }
 0x205   : > { %2288 = dma.done.wait (%p1734_p3), %s1455_s27, 4096  }
 0x206   : > { %2290 = vsyncadd (%p1734_p3), %s1455_s27, 4294963200  ;;  %s24_s17 = sadd.s32 1, %s2313_s17   ;;  %s3004_s12 = smov %s2297_s13 }
 0x207   : > { %p21_p5 = scmp.ge.s32.totalorder %s24_s17, 4   ;;  %s3005_s13 = smov %s2301_s14 }
 0x208   : > { %s3006_s14 = smov %s2443_s19  ;;  %s3007_s15 = smov %s2309_s16 }
 0x209   : > { %s3008_s16 = smov %s3010_s28  ;;  %23 = sbr.rel (!%p21_p5) target bundleno = 9 (0x9), region = 94 }
 0x20e   :  { %1460 = vsyncpa [#allocation3], 1 }
 0x20f   :  { %1462 = vsyncpa [#allocation3 + $0x1], 1 }
 0x210   :  { %1463 = vsyncpa [#allocation6], 1 }
 0x211   :  { %1464 = vsyncpa [#allocation4], 1 }
 0x212   :  { %1466 = vsyncpa [#allocation4 + $0x1], 1 }
 0x213   :  { %1467 = vsyncpa [#allocation9], 1 }
 0x214   :  { %1469 = vsyncpa [#allocation9 + $0x1], 1 }

</bundles_post_ra>
